<compile_context>
chip_gen: v7x
topology: tpu7x:2x2x1
jax: 0.10.0
libtpu: 0.0.40
codegen_flags: <defaults>
</compile_context>

<pallas_src>
import functools
import math

import jax
import jax.numpy as jnp
from jax.experimental import pallas as pl
from jax.experimental.pallas import tpu as pltpu


def _mha_kernel(q_ref, k_ref, v_ref,
                w_el_ref, b_el_ref,
                wq_ref, wk_ref, wv_ref, wfc_ref,
                gamma_ref, beta_ref,
                *out_refs,
                num_heads, dim_keys, dim_values, eps, compute_dtype, emit_attn):
    out_ref = out_refs[0]
    attn_ref = out_refs[1] if emit_attn else None

    TB, Sq, Dq_in = q_ref.shape
    _, Sk, D = k_ref.shape
    H, Dk, Dv = num_heads, dim_keys, dim_values
    Nq = TB * Sq
    Nk = TB * Sk

    cast = lambda x: x.astype(compute_dtype)

    # Flatten the batch tile so the projection matmuls have a large M dim.
    q2 = cast(q_ref[...].reshape(Nq, Dq_in))
    k2 = cast(k_ref[...].reshape(Nk, D))
    v2 = cast(v_ref[...].reshape(Nk, D))

    # elongate_queries: Linear(D/2 -> D) with bias; the residual stays f32.
    qe = jnp.dot(q2, w_el_ref[...], preferred_element_type=jnp.float32) + b_el_ref[0]
    qe_c = cast(qe)

    # Fused Q/K/V projections (no bias), full H*Dk MXU N width.  1/sqrt(dk)
    # is pre-folded into wq by the wrapper (one-time weight transform).
    Q = jnp.dot(qe_c, wq_ref[...], preferred_element_type=jnp.float32)   # (Nq, H*Dk)
    K = jnp.dot(k2, wk_ref[...], preferred_element_type=jnp.float32)     # (Nk, H*Dk)
    V = jnp.dot(v2, wv_ref[...], preferred_element_type=jnp.float32)     # (Nk, H*Dv)

    Q3 = cast(Q).reshape(TB, Sq, H * Dk)
    K3 = cast(K).reshape(TB, Sk, H * Dk)
    V3 = cast(V).reshape(TB, Sk, H * Dv)

    # Accumulate the output projection straight onto the residual: only one
    # (Nq, D) f32 slab stays live and the final += is free.
    acc = qe

    # Per-head attention, batched over the batch tile with Mosaic-native 3-D
    # batched einsums.  Compared with the old head-major to_heads() path this
    # removes every lane-splitting reshape / einshape relayout of
    # (Nq, H*Dk)-sized tensors: the only cross-lane work is a static Dk-wide
    # slice per head, and ctx never needs the 'hnd->nhd' relayout because wfc
    # arrives as (H, Dv, D) and is contracted head by head.  It also bounds the
    # quadratic (Sq, Sk) softmax intermediates to a single head at a time.
    for h in range(H):
        qh = Q3[:, :, h * Dk:(h + 1) * Dk]          # (TB, Sq, Dk)
        kh = K3[:, :, h * Dk:(h + 1) * Dk]          # (TB, Sk, Dk)
        vh = V3[:, :, h * Dv:(h + 1) * Dv]          # (TB, Sk, Dv)

        s = jnp.einsum('bqd,bkd->bqk', qh, kh,
                       preferred_element_type=jnp.float32)       # (TB, Sq, Sk)
        # TODO(synk): optional attention mask (masked_fill) not implemented;
        # the module is exercised with mask=None.
        m = jnp.max(s, axis=-1, keepdims=True)
        p = jnp.exp(s - m)
        # EUP approx reciprocal: ~1e-4 relative error on the row sums, well
        # inside bf16 matmul noise and the validation tolerance.
        attn_h = p * pl.reciprocal(jnp.sum(p, axis=-1, keepdims=True), approx=True)

        if emit_attn:
            # Freshly computed (TB, Sq, Sk) slab with Sk on lanes; storing per
            # head avoids ever materializing / transposing all-head attention
            # weights in VMEM.
            attn_ref[:, h, :, :] = attn_h.astype(attn_ref.dtype)

        ctx_h = jnp.einsum('bqk,bkd->bqd', cast(attn_h), vh,
                           preferred_element_type=jnp.float32)    # (TB, Sq, Dv)
        acc = acc + jnp.dot(cast(ctx_h).reshape(Nq, Dv), wfc_ref[h],
                            preferred_element_type=jnp.float32)

    # TODO(synk): dropout is identity (eval mode); training-mode dropout not reproduced.

    # LayerNorm over the last dim (eps=1e-6, affine), single-pass statistics
    # (sum and sum-of-squares together instead of two reduction sweeps).
    inv_d = 1.0 / D
    s1 = jnp.sum(acc, axis=-1, keepdims=True)
    s2 = jnp.sum(acc * acc, axis=-1, keepdims=True)
    mean = s1 * inv_d
    var = s2 * inv_d - mean * mean
    o = (acc - mean) * jax.lax.rsqrt(var + eps)
    o = o * gamma_ref[0] + beta_ref[0]

    out_ref[...] = o.reshape(TB, Sq, D).astype(out_ref.dtype)


def _vmem_capacity_bytes():
    """Physical VMEM per TensorCore, generation-aware, with safe fallbacks."""
    try:
        cap = getattr(pltpu.get_tpu_info(), "vmem_capacity_bytes", None)
        if cap:
            return int(cap)
    except Exception:
        pass
    try:
        kind = jax.devices()[0].device_kind.lower()
        if "v7" in kind:
            return 64 * 1024 * 1024
        if any(v in kind for v in ("v4", "v5", "v6")):
            return 128 * 1024 * 1024
    except Exception:
        pass
    return 64 * 1024 * 1024                       # conservative: fits every generation


def _mxu_row_target():
    """MXU M rows needed to amortize push/pop: 256 for the 128-wide v5 MXUs,
    512 for the 256-wide v6e/v7x MXUs."""
    try:
        if "v5" in jax.devices()[0].device_kind.lower():
            return 256
    except Exception:
        pass
    return 512


def _estimate_step_bytes(tb, Sq, Sk, D, Dq_in, H, Dk, Dv, attn_bytes, compute_bytes):
    """Conservative per-grid-step VMEM estimate (double buffering + live values)."""
    nq, nk = tb * Sq, tb * Sk
    f32 = 4
    # Double-buffered input / output blocks moved by the Pallas pipeline.
    io = 2 * f32 * tb * (Sq * Dq_in + 2 * Sk * D)
    io += 2 * f32 * tb * Sq * D
    io += 2 * attn_bytes * tb * H * Sq * Sk
    # Invariant operands; counted double-buffered to stay conservative.
    w = 2 * (compute_bytes * (Dq_in * D + 3 * D * H * Dk + H * Dv * D) + f32 * 3 * D)
    # In-kernel live values, with a 1.5x margin for cast copies / reshape
    # temporaries (the f32 residual + accumulator stay live the whole body).
    live = f32 * 2 * nq * D                                                    # residual + acc
    live += (f32 + compute_bytes) * (nq * H * Dk + nk * H * Dk + nk * H * Dv)  # Q/K/V f32 + cast
    live += compute_bytes * (nq * Dq_in + 2 * nk * D)                          # cast input copies
    live += f32 * (3 * tb * Sq * Sk + 2 * tb * Sq * Dv)                        # per-head temps
    return io + w + int(1.5 * live)


def _choose_batch_tile(B, Sq, Sk, D, Dq_in, H, Dk, Dv, *,
                       attn_bytes, compute_bytes, vmem_budget_bytes, row_target):
    """Largest divisor of B whose per-step footprint fits the VMEM budget,
    capped so the grid keeps >= 2 steps (both v7x TensorCores stay busy and the
    pipeline has something to overlap)."""
    max_tb = max(1, B // 2)
    best = 1
    for tb in range(1, max_tb + 1):
        if B % tb:
            continue
        if _estimate_step_bytes(tb, Sq, Sk, D, Dq_in, H, Dk, Dv,
                                attn_bytes, compute_bytes) <= vmem_budget_bytes:
            best = tb
        if tb * Sq >= row_target:     # enough rows to fill the MXU M dimension
            break
    return best


def multi_head_attention(queries, keys, values, params, *,
                         num_heads, dim_keys, dim_values,
                         compute_dtype=jnp.bfloat16,
                         attn_dtype=None,
                         return_attn=True):
    """queries: (B, Sq, D/2); keys: (B, Sk, D); values: (B, Sv, D)."""
    B, Sq, Dq_in = queries.shape
    _, Sk, D = keys.shape
    _, Sv, _ = values.shape
    assert Sv == Sk, "values and keys must share sequence length for attention"
    # The PyTorch module projects V with width num_heads*dim_keys and then views
    # it as dim_values per head; that is only self-consistent when they match.
    assert dim_keys == dim_values, "module requires dim_keys == dim_values"
    assert 2 * Dq_in == D, "elongate_queries expects queries of width input_dim/2"

    H, Dk, Dv = num_heads, dim_keys, dim_values
    w_el, b_el, wq, wk, wv, wfc, gamma, beta = params

    # Ship matmul weights pre-cast to the MXU compute dtype (halves their
    # HBM->VMEM DMA and resident VMEM; removes per-step cast copies), fold
    # 1/sqrt(dk) into wq once, and reshape wfc to (H, Dv, D) so the output
    # projection contracts per head without relayouting ctx.
    cd = jnp.dtype(compute_dtype)
    inv_temp = 1.0 / (dim_keys ** 0.5)
    w_el_c = w_el.astype(cd)
    wq_c = (wq * inv_temp).astype(cd)
    wk_c = wk.astype(cd)
    wv_c = wv.astype(cd)
    wfc_c = wfc.reshape(H, Dv, D).astype(cd)
    b_el2 = b_el.reshape(1, D).astype(jnp.float32)
    gamma2 = gamma.reshape(1, D).astype(jnp.float32)
    beta2 = beta.reshape(1, D).astype(jnp.float32)

    attn_dt = jnp.dtype(queries.dtype if attn_dtype is None else attn_dtype)

    vmem_cap = _vmem_capacity_bytes()
    TB = _choose_batch_tile(
        B, Sq, Sk, D, Dq_in, H, Dk, Dv,
        attn_bytes=attn_dt.itemsize if return_attn else 0,
        compute_bytes=cd.itemsize,
        vmem_budget_bytes=vmem_cap // 3,   # headroom for double buffers / scratch
        row_target=_mxu_row_target())
    # TODO(synk): for very long sequences, additionally tile Sq (second grid
    # axis) so the (Sq, Sk) score blocks stay bounded independently of TB.

    kernel = functools.partial(
        _mha_kernel, num_heads=H, dim_keys=Dk, dim_values=Dv,
        eps=1e-6, compute_dtype=cd, emit_attn=return_attn)

    out_shapes = [jax.ShapeDtypeStruct((B, Sq, D), jnp.float32)]
    out_specs = [pl.BlockSpec((TB, Sq, D), lambda b: (b, 0, 0))]
    if return_attn:
        out_shapes.append(jax.ShapeDtypeStruct((B, H, Sq, Sk), attn_dt))
        out_specs.append(pl.BlockSpec((TB, H, Sq, Sk), lambda b: (b, 0, 0, 0)))

    def full(arr):
        nd = arr.ndim
        return pl.BlockSpec(arr.shape, lambda b: (0,) * nd)

    # Invariant operands keep a constant index_map, so the pipeline re-uses the
    # resident block between consecutive steps instead of re-fetching it.
    grid_spec = pltpu.PrefetchScalarGridSpec(
        num_scalar_prefetch=0,
        grid=(B // TB,),
        in_specs=[
            pl.BlockSpec((TB, Sq, Dq_in), lambda b: (b, 0, 0)),
            pl.BlockSpec((TB, Sk, D),     lambda b: (b, 0, 0)),
            pl.BlockSpec((TB, Sv, D),     lambda b: (b, 0, 0)),
            full(w_el_c), full(b_el2),
            full(wq_c), full(wk_c), full(wv_c), full(wfc_c),
            full(gamma2), full(beta2),
        ],
        out_specs=out_specs,
    )

    flops = 2 * B * (Sq * Dq_in * D            # elongate
                     + Sq * D * H * Dk         # Q projection
                     + 2 * Sk * D * H * Dk     # K, V projections
                     + H * Sq * Sk * Dk        # scores
                     + H * Sq * Sk * Dv        # attn @ V
                     + Sq * H * Dv * D)        # output projection
    transcendentals = B * H * Sq * Sk          # softmax exp
    bytes_accessed = (4 * (B * Sq * Dq_in + 2 * B * Sk * D + B * Sq * D + 3 * D)
                      + (attn_dt.itemsize * B * H * Sq * Sk if return_attn else 0)
                      + cd.itemsize * (Dq_in * D + 3 * D * H * Dk + H * Dv * D))

    results = pl.pallas_call(
        kernel,
        out_shape=out_shapes,
        grid_spec=grid_spec,
        compiler_params=pltpu.CompilerParams(
            dimension_semantics=("parallel",),
            vmem_limit_bytes=int(vmem_cap * 3 // 4)),
        cost_estimate=pl.CostEstimate(
            flops=int(flops), transcendentals=int(transcendentals),
            bytes_accessed=int(bytes_accessed)),
    )(queries, keys, values, w_el_c, b_el2, wq_c, wk_c, wv_c, wfc_c,
      gamma2, beta2)

    if return_attn:
        out, attn = results
        return out, attn
    return results[0]


def init_params(key, input_dim, num_heads, dim_keys, dim_values):
    """Deterministic PyTorch-style uniform init. Weights stored as (in, out), f32."""
    half = input_dim // 2
    ks = jax.random.split(key, 6)

    def unif(k, shape, fan_in):
        bound = 1.0 / math.sqrt(fan_in)
        return jax.random.uniform(k, shape, jnp.float32, -bound, bound)

    w_el = unif(ks[0], (half, input_dim), half)
    b_el = unif(ks[1], (input_dim,), half)
    wq = unif(ks[2], (input_dim, num_heads * dim_keys), input_dim)
    wk = unif(ks[3], (input_dim, num_heads * dim_keys), input_dim)
    # NOTE: the PyTorch module sizes weight_values with dim_keys (not dim_values).
    wv = unif(ks[4], (input_dim, num_heads * dim_keys), input_dim)
    wfc = unif(ks[5], (num_heads * dim_values, input_dim), num_heads * dim_values)
    gamma = jnp.ones((input_dim,), jnp.float32)
    beta = jnp.zeros((input_dim,), jnp.float32)
    return (w_el, b_el, wq, wk, wv, wfc, gamma, beta)


def mha_reference(queries, keys, values, params, *,
                  num_heads, dim_keys, dim_values, eps=1e-6):
    """Pure-JAX f32 reference matching the PyTorch forward (eval mode, mask=None)."""
    w_el, b_el, wq, wk, wv, wfc, gamma, beta = params
    B, Sq, _ = queries.shape
    Sk = keys.shape[1]
    qe = queries @ w_el + b_el
    residual = qe
    Q = (qe @ wq).reshape(B, Sq, num_heads, dim_keys).transpose(0, 2, 1, 3)
    K = (keys @ wk).reshape(B, Sk, num_heads, dim_keys).transpose(0, 2, 1, 3)
    V = (values @ wv).reshape(B, Sk, num_heads, dim_values).transpose(0, 2, 1, 3)
    scores = jnp.einsum('bhqd,bhkd->bhqk', Q, K) / (dim_keys ** 0.5)
    attn = jax.nn.softmax(scores, axis=-1)
    ctx = jnp.einsum('bhqk,bhkd->bhqd', attn, V)
    ctx = ctx.transpose(0, 2, 1, 3).reshape(B, Sq, num_heads * dim_values)
    o = ctx @ wfc + residual
    mean = o.mean(-1, keepdims=True)
    var = ((o - mean) ** 2).mean(-1, keepdims=True)
    o = (o - mean) / jnp.sqrt(var + eps) * gamma + beta
    return o, attn


if __name__ == "__main__":
    # Small shapes consistent with the module's forward.
    batch, seq, input_dim = 2, 8, 32
    num_heads, dim_keys, dim_values = 4, 8, 8

    key = jax.random.PRNGKey(0)
    kq, kk, kv, kp = jax.random.split(key, 4)
    queries = jax.random.normal(kq, (batch, seq, input_dim // 2), jnp.float32)
    keys = jax.random.normal(kk, (batch, seq, input_dim), jnp.float32)
    values = jax.random.normal(kv, (batch, seq, input_dim), jnp.float32)

    params = init_params(kp, input_dim, num_heads, dim_keys, dim_values)

    out, attn = multi_head_attention(
        queries, keys, values, params,
        num_heads=num_heads, dim_keys=dim_keys, dim_values=dim_values)
    jax.block_until_ready((out, attn))

    assert out.shape == (batch, seq, input_dim)
    assert attn.shape == (batch, num_heads, seq, seq)
    assert out.dtype == jnp.float32 and attn.dtype == jnp.float32

    out_expected, attn_expected = mha_reference(
        queries, keys, values, params,
        num_heads=num_heads, dim_keys=dim_keys, dim_values=dim_values)
    assert jnp.allclose(out, out_expected, rtol=2e-2, atol=2e-2)
    assert jnp.allclose(attn, attn_expected, rtol=2e-2, atol=2e-2)

    print("KERNEL_OK")
</pallas_src>

<mosaic_0001>
module attributes {stable_mosaic.version = 11 : i64} {
  func.func @_mha_kernel(%arg0: i32, %arg1: memref<1x8x16xf32, #tpu.memory_space<vmem>>, %arg2: memref<1x8x32xf32, #tpu.memory_space<vmem>>, %arg3: memref<1x8x32xf32, #tpu.memory_space<vmem>>, %arg4: memref<16x32xbf16, #tpu.memory_space<vmem>>, %arg5: memref<1x32xf32, #tpu.memory_space<vmem>>, %arg6: memref<32x32xbf16, #tpu.memory_space<vmem>>, %arg7: memref<32x32xbf16, #tpu.memory_space<vmem>>, %arg8: memref<32x32xbf16, #tpu.memory_space<vmem>>, %arg9: memref<4x8x32xbf16, #tpu.memory_space<vmem>>, %arg10: memref<1x32xf32, #tpu.memory_space<vmem>>, %arg11: memref<1x32xf32, #tpu.memory_space<vmem>>, %arg12: memref<1x8x32xf32, #tpu.memory_space<vmem>>, %arg13: memref<1x4x8x8xf32, #tpu.memory_space<vmem>>) attributes {dimension_semantics = [#tpu.dimension_semantics<parallel>], iteration_bounds = array<i64: 2>, scalar_prefetch = 0 : i64, scratch_operands = 0 : i64, tpu.core_type = #tpu.core_type<tc>, window_params = [{transform_indices = @transform_0, window_bounds = array<i64: 1, 8, 16>}, {transform_indices = @transform_1, window_bounds = array<i64: 1, 8, 32>}, {transform_indices = @transform_2, window_bounds = array<i64: 1, 8, 32>}, {pipeline_mode = #tpu.pipeline_mode<synchronous>, transform_indices = @transform_3, window_bounds = array<i64: 16, 32>}, {pipeline_mode = #tpu.pipeline_mode<synchronous>, transform_indices = @transform_4, window_bounds = array<i64: 1, 32>}, {pipeline_mode = #tpu.pipeline_mode<synchronous>, transform_indices = @transform_5, window_bounds = array<i64: 32, 32>}, {pipeline_mode = #tpu.pipeline_mode<synchronous>, transform_indices = @transform_6, window_bounds = array<i64: 32, 32>}, {pipeline_mode = #tpu.pipeline_mode<synchronous>, transform_indices = @transform_7, window_bounds = array<i64: 32, 32>}, {pipeline_mode = #tpu.pipeline_mode<synchronous>, transform_indices = @transform_8, window_bounds = array<i64: 4, 8, 32>}, {pipeline_mode = #tpu.pipeline_mode<synchronous>, transform_indices = @transform_9, window_bounds = array<i64: 1, 32>}, {pipeline_mode = #tpu.pipeline_mode<synchronous>, transform_indices = @transform_10, window_bounds = array<i64: 1, 32>}, {transform_indices = @transform_11, window_bounds = array<i64: 1, 8, 32>}, {transform_indices = @transform_12, window_bounds = array<i64: 1, 4, 8, 8>}]} {
    %c0 = arith.constant 0 : index
    %c0_0 = arith.constant 0 : index
    %c0_1 = arith.constant 0 : index
    %0 = vector.load %arg1[%c0, %c0_0, %c0_1] : memref<1x8x16xf32, #tpu.memory_space<vmem>>, vector<1x8x16xf32>
    %1 = vector.shape_cast %0 : vector<1x8x16xf32> to vector<8x16xf32>
    %2 = arith.truncf %1 : vector<8x16xf32> to vector<8x16xbf16>
    %c0_2 = arith.constant 0 : index
    %c0_3 = arith.constant 0 : index
    %c0_4 = arith.constant 0 : index
    %3 = vector.load %arg2[%c0_2, %c0_3, %c0_4] : memref<1x8x32xf32, #tpu.memory_space<vmem>>, vector<1x8x32xf32>
    %4 = vector.shape_cast %3 : vector<1x8x32xf32> to vector<8x32xf32>
    %5 = arith.truncf %4 : vector<8x32xf32> to vector<8x32xbf16>
    %c0_5 = arith.constant 0 : index
    %c0_6 = arith.constant 0 : index
    %c0_7 = arith.constant 0 : index
    %6 = vector.load %arg3[%c0_5, %c0_6, %c0_7] : memref<1x8x32xf32, #tpu.memory_space<vmem>>, vector<1x8x32xf32>
    %7 = vector.shape_cast %6 : vector<1x8x32xf32> to vector<8x32xf32>
    %8 = arith.truncf %7 : vector<8x32xf32> to vector<8x32xbf16>
    %c0_8 = arith.constant 0 : index
    %c0_9 = arith.constant 0 : index
    %9 = vector.load %arg4[%c0_8, %c0_9] : memref<16x32xbf16, #tpu.memory_space<vmem>>, vector<16x32xbf16>
    %cst = arith.constant dense<0.000000e+00> : vector<8x32xf32>
    %10 = tpu.matmul %2, %9, %cst {dimension_numbers = #tpu.dot_dimension_numbers<[1], [0], [0], [1], [0, 0, 1, 1], [], []>} : vector<8x16xbf16>, vector<16x32xbf16>, vector<8x32xf32> -> vector<8x32xf32>
    %c0_10 = arith.constant 0 : index
    %c0_11 = arith.constant 0 : index
    %11 = vector.load %arg5[%c0_10, %c0_11] : memref<1x32xf32, #tpu.memory_space<vmem>>, vector<1x32xf32>
    %12 = vector.shape_cast %11 : vector<1x32xf32> to vector<32xf32>
    %13 = vector.shape_cast %12 : vector<32xf32> to vector<1x32xf32>
    %14 = vector.broadcast %13 : vector<1x32xf32> to vector<8x32xf32>
    %15 = arith.addf %10, %14 : vector<8x32xf32>
    %16 = arith.truncf %15 : vector<8x32xf32> to vector<8x32xbf16>
    %c0_12 = arith.constant 0 : index
    %c0_13 = arith.constant 0 : index
    %17 = vector.load %arg6[%c0_12, %c0_13] : memref<32x32xbf16, #tpu.memory_space<vmem>>, vector<32x32xbf16>
    %cst_14 = arith.constant dense<0.000000e+00> : vector<8x32xf32>
    %18 = tpu.matmul %16, %17, %cst_14 {dimension_numbers = #tpu.dot_dimension_numbers<[1], [0], [0], [1], [0, 0, 1, 1], [], []>} : vector<8x32xbf16>, vector<32x32xbf16>, vector<8x32xf32> -> vector<8x32xf32>
    %c0_15 = arith.constant 0 : index
    %c0_16 = arith.constant 0 : index
    %19 = vector.load %arg7[%c0_15, %c0_16] : memref<32x32xbf16, #tpu.memory_space<vmem>>, vector<32x32xbf16>
    %cst_17 = arith.constant dense<0.000000e+00> : vector<8x32xf32>
    %20 = tpu.matmul %5, %19, %cst_17 {dimension_numbers = #tpu.dot_dimension_numbers<[1], [0], [0], [1], [0, 0, 1, 1], [], []>} : vector<8x32xbf16>, vector<32x32xbf16>, vector<8x32xf32> -> vector<8x32xf32>
    %c0_18 = arith.constant 0 : index
    %c0_19 = arith.constant 0 : index
    %21 = vector.load %arg8[%c0_18, %c0_19] : memref<32x32xbf16, #tpu.memory_space<vmem>>, vector<32x32xbf16>
    %cst_20 = arith.constant dense<0.000000e+00> : vector<8x32xf32>
    %22 = tpu.matmul %8, %21, %cst_20 {dimension_numbers = #tpu.dot_dimension_numbers<[1], [0], [0], [1], [0, 0, 1, 1], [], []>} : vector<8x32xbf16>, vector<32x32xbf16>, vector<8x32xf32> -> vector<8x32xf32>
    %23 = arith.truncf %18 : vector<8x32xf32> to vector<8x32xbf16>
    %24 = vector.shape_cast %23 : vector<8x32xbf16> to vector<1x8x32xbf16>
    %25 = arith.truncf %20 : vector<8x32xf32> to vector<8x32xbf16>
    %26 = vector.shape_cast %25 : vector<8x32xbf16> to vector<1x8x32xbf16>
    %27 = arith.truncf %22 : vector<8x32xf32> to vector<8x32xbf16>
    %28 = vector.shape_cast %27 : vector<8x32xbf16> to vector<1x8x32xbf16>
    %29 = vector.extract_strided_slice %24 {offsets = [0, 0, 0], sizes = [1, 8, 8], strides = [1, 1, 1]} : vector<1x8x32xbf16> to vector<1x8x8xbf16>
    %30 = vector.extract_strided_slice %26 {offsets = [0, 0, 0], sizes = [1, 8, 8], strides = [1, 1, 1]} : vector<1x8x32xbf16> to vector<1x8x8xbf16>
    %31 = vector.extract_strided_slice %28 {offsets = [0, 0, 0], sizes = [1, 8, 8], strides = [1, 1, 1]} : vector<1x8x32xbf16> to vector<1x8x8xbf16>
    "tpu.trace_start"() <{level = 10 : i32, message = "bqd,bkd->bqk"}> : () -> ()
    %cst_21 = arith.constant dense<0.000000e+00> : vector<1x8x8xf32>
    %32 = tpu.matmul %29, %30, %cst_21 {dimension_numbers = #tpu.dot_dimension_numbers<[2], [2], [1], [1], [0, 0, 0, 1, 1, 1], [0], [0]>} : vector<1x8x8xbf16>, vector<1x8x8xbf16>, vector<1x8x8xf32> -> vector<1x8x8xf32>
    "tpu.trace_stop"() : () -> ()
    %cst_22 = arith.constant dense<0xFF800000> : vector<1x8xf32>
    %33 = vector.multi_reduction <maximumf>, %32, %cst_22 [2] : vector<1x8x8xf32> to vector<1x8xf32>
    %34 = vector.shape_cast %33 : vector<1x8xf32> to vector<1x8x1xf32>
    %35 = vector.broadcast %34 : vector<1x8x1xf32> to vector<1x8x8xf32>
    %36 = arith.subf %32, %35 : vector<1x8x8xf32>
    %37 = math.exp %36 : vector<1x8x8xf32>
    %cst_23 = arith.constant dense<0.000000e+00> : vector<1x8xf32>
    %38 = vector.multi_reduction <add>, %37, %cst_23 [2] : vector<1x8x8xf32> to vector<1x8xf32>
    %39 = vector.shape_cast %38 : vector<1x8xf32> to vector<1x8x1xf32>
    %40 = tpu.reciprocal %39 {approx = true} : vector<1x8x1xf32> -> vector<1x8x1xf32>
    %41 = vector.broadcast %40 : vector<1x8x1xf32> to vector<1x8x8xf32>
    %42 = arith.mulf %37, %41 : vector<1x8x8xf32>
    %c0_24 = arith.constant 0 : index
    %c0_25 = arith.constant 0 : index
    %c0_26 = arith.constant 0 : index
    %c0_27 = arith.constant 0 : index
    %43 = vector.load %arg13[%c0_24, %c0_25, %c0_26, %c0_27] : memref<1x4x8x8xf32, #tpu.memory_space<vmem>>, vector<1x1x8x8xf32>
    %44 = vector.shape_cast %43 : vector<1x1x8x8xf32> to vector<1x8x8xf32>
    %45 = vector.shape_cast %42 : vector<1x8x8xf32> to vector<1x1x8x8xf32>
    tpu.vector_store %arg13[%c0_24, %c0_25, %c0_26, %c0_27], %45 {strides = array<i32>} : memref<1x4x8x8xf32, #tpu.memory_space<vmem>>, vector<1x1x8x8xf32>,
    %46 = arith.truncf %42 : vector<1x8x8xf32> to vector<1x8x8xbf16>
    "tpu.trace_start"() <{level = 10 : i32, message = "bqk,bkd->bqd"}> : () -> ()
    %cst_28 = arith.constant dense<0.000000e+00> : vector<1x8x8xf32>
    %47 = tpu.matmul %46, %31, %cst_28 {dimension_numbers = #tpu.dot_dimension_numbers<[2], [1], [1], [2], [0, 0, 0, 1, 1, 2], [0], [0]>} : vector<1x8x8xbf16>, vector<1x8x8xbf16>, vector<1x8x8xf32> -> vector<1x8x8xf32>
    "tpu.trace_stop"() : () -> ()
    %48 = arith.truncf %47 : vector<1x8x8xf32> to vector<1x8x8xbf16>
    %49 = vector.shape_cast %48 : vector<1x8x8xbf16> to vector<8x8xbf16>
    %c0_29 = arith.constant 0 : index
    %c0_30 = arith.constant 0 : index
    %c0_31 = arith.constant 0 : index
    %50 = vector.load %arg9[%c0_29, %c0_30, %c0_31] : memref<4x8x32xbf16, #tpu.memory_space<vmem>>, vector<1x8x32xbf16>
    %51 = vector.shape_cast %50 : vector<1x8x32xbf16> to vector<8x32xbf16>
    %cst_32 = arith.constant dense<0.000000e+00> : vector<8x32xf32>
    %52 = tpu.matmul %49, %51, %cst_32 {dimension_numbers = #tpu.dot_dimension_numbers<[1], [0], [0], [1], [0, 0, 1, 1], [], []>} : vector<8x8xbf16>, vector<8x32xbf16>, vector<8x32xf32> -> vector<8x32xf32>
    %53 = arith.addf %15, %52 : vector<8x32xf32>
    %54 = vector.extract_strided_slice %24 {offsets = [0, 0, 8], sizes = [1, 8, 8], strides = [1, 1, 1]} : vector<1x8x32xbf16> to vector<1x8x8xbf16>
    %55 = vector.extract_strided_slice %26 {offsets = [0, 0, 8], sizes = [1, 8, 8], strides = [1, 1, 1]} : vector<1x8x32xbf16> to vector<1x8x8xbf16>
    %56 = vector.extract_strided_slice %28 {offsets = [0, 0, 8], sizes = [1, 8, 8], strides = [1, 1, 1]} : vector<1x8x32xbf16> to vector<1x8x8xbf16>
    "tpu.trace_start"() <{level = 10 : i32, message = "bqd,bkd->bqk"}> : () -> ()
    %cst_33 = arith.constant dense<0.000000e+00> : vector<1x8x8xf32>
    %57 = tpu.matmul %54, %55, %cst_33 {dimension_numbers = #tpu.dot_dimension_numbers<[2], [2], [1], [1], [0, 0, 0, 1, 1, 1], [0], [0]>} : vector<1x8x8xbf16>, vector<1x8x8xbf16>, vector<1x8x8xf32> -> vector<1x8x8xf32>
    "tpu.trace_stop"() : () -> ()
    %cst_34 = arith.constant dense<0xFF800000> : vector<1x8xf32>
    %58 = vector.multi_reduction <maximumf>, %57, %cst_34 [2] : vector<1x8x8xf32> to vector<1x8xf32>
    %59 = vector.shape_cast %58 : vector<1x8xf32> to vector<1x8x1xf32>
    %60 = vector.broadcast %59 : vector<1x8x1xf32> to vector<1x8x8xf32>
    %61 = arith.subf %57, %60 : vector<1x8x8xf32>
    %62 = math.exp %61 : vector<1x8x8xf32>
    %cst_35 = arith.constant dense<0.000000e+00> : vector<1x8xf32>
    %63 = vector.multi_reduction <add>, %62, %cst_35 [2] : vector<1x8x8xf32> to vector<1x8xf32>
    %64 = vector.shape_cast %63 : vector<1x8xf32> to vector<1x8x1xf32>
    %65 = tpu.reciprocal %64 {approx = true} : vector<1x8x1xf32> -> vector<1x8x1xf32>
    %66 = vector.broadcast %65 : vector<1x8x1xf32> to vector<1x8x8xf32>
    %67 = arith.mulf %62, %66 : vector<1x8x8xf32>
    %c0_36 = arith.constant 0 : index
    %c1 = arith.constant 1 : index
    %c0_37 = arith.constant 0 : index
    %c0_38 = arith.constant 0 : index
    %68 = vector.load %arg13[%c0_36, %c1, %c0_37, %c0_38] : memref<1x4x8x8xf32, #tpu.memory_space<vmem>>, vector<1x1x8x8xf32>
    %69 = vector.shape_cast %68 : vector<1x1x8x8xf32> to vector<1x8x8xf32>
    %70 = vector.shape_cast %67 : vector<1x8x8xf32> to vector<1x1x8x8xf32>
    tpu.vector_store %arg13[%c0_36, %c1, %c0_37, %c0_38], %70 {strides = array<i32>} : memref<1x4x8x8xf32, #tpu.memory_space<vmem>>, vector<1x1x8x8xf32>,
    %71 = arith.truncf %67 : vector<1x8x8xf32> to vector<1x8x8xbf16>
    "tpu.trace_start"() <{level = 10 : i32, message = "bqk,bkd->bqd"}> : () -> ()
    %cst_39 = arith.constant dense<0.000000e+00> : vector<1x8x8xf32>
    %72 = tpu.matmul %71, %56, %cst_39 {dimension_numbers = #tpu.dot_dimension_numbers<[2], [1], [1], [2], [0, 0, 0, 1, 1, 2], [0], [0]>} : vector<1x8x8xbf16>, vector<1x8x8xbf16>, vector<1x8x8xf32> -> vector<1x8x8xf32>
    "tpu.trace_stop"() : () -> ()
    %73 = arith.truncf %72 : vector<1x8x8xf32> to vector<1x8x8xbf16>
    %74 = vector.shape_cast %73 : vector<1x8x8xbf16> to vector<8x8xbf16>
    %c1_40 = arith.constant 1 : index
    %c0_41 = arith.constant 0 : index
    %c0_42 = arith.constant 0 : index
    %75 = vector.load %arg9[%c1_40, %c0_41, %c0_42] : memref<4x8x32xbf16, #tpu.memory_space<vmem>>, vector<1x8x32xbf16>
    %76 = vector.shape_cast %75 : vector<1x8x32xbf16> to vector<8x32xbf16>
    %cst_43 = arith.constant dense<0.000000e+00> : vector<8x32xf32>
    %77 = tpu.matmul %74, %76, %cst_43 {dimension_numbers = #tpu.dot_dimension_numbers<[1], [0], [0], [1], [0, 0, 1, 1], [], []>} : vector<8x8xbf16>, vector<8x32xbf16>, vector<8x32xf32> -> vector<8x32xf32>
    %78 = arith.addf %53, %77 : vector<8x32xf32>
    %79 = vector.extract_strided_slice %24 {offsets = [0, 0, 16], sizes = [1, 8, 8], strides = [1, 1, 1]} : vector<1x8x32xbf16> to vector<1x8x8xbf16>
    %80 = vector.extract_strided_slice %26 {offsets = [0, 0, 16], sizes = [1, 8, 8], strides = [1, 1, 1]} : vector<1x8x32xbf16> to vector<1x8x8xbf16>
    %81 = vector.extract_strided_slice %28 {offsets = [0, 0, 16], sizes = [1, 8, 8], strides = [1, 1, 1]} : vector<1x8x32xbf16> to vector<1x8x8xbf16>
    "tpu.trace_start"() <{level = 10 : i32, message = "bqd,bkd->bqk"}> : () -> ()
    %cst_44 = arith.constant dense<0.000000e+00> : vector<1x8x8xf32>
    %82 = tpu.matmul %79, %80, %cst_44 {dimension_numbers = #tpu.dot_dimension_numbers<[2], [2], [1], [1], [0, 0, 0, 1, 1, 1], [0], [0]>} : vector<1x8x8xbf16>, vector<1x8x8xbf16>, vector<1x8x8xf32> -> vector<1x8x8xf32>
    "tpu.trace_stop"() : () -> ()
    %cst_45 = arith.constant dense<0xFF800000> : vector<1x8xf32>
    %83 = vector.multi_reduction <maximumf>, %82, %cst_45 [2] : vector<1x8x8xf32> to vector<1x8xf32>
    %84 = vector.shape_cast %83 : vector<1x8xf32> to vector<1x8x1xf32>
    %85 = vector.broadcast %84 : vector<1x8x1xf32> to vector<1x8x8xf32>
    %86 = arith.subf %82, %85 : vector<1x8x8xf32>
    %87 = math.exp %86 : vector<1x8x8xf32>
    %cst_46 = arith.constant dense<0.000000e+00> : vector<1x8xf32>
    %88 = vector.multi_reduction <add>, %87, %cst_46 [2] : vector<1x8x8xf32> to vector<1x8xf32>
    %89 = vector.shape_cast %88 : vector<1x8xf32> to vector<1x8x1xf32>
    %90 = tpu.reciprocal %89 {approx = true} : vector<1x8x1xf32> -> vector<1x8x1xf32>
    %91 = vector.broadcast %90 : vector<1x8x1xf32> to vector<1x8x8xf32>
    %92 = arith.mulf %87, %91 : vector<1x8x8xf32>
    %c0_47 = arith.constant 0 : index
    %c2 = arith.constant 2 : index
    %c0_48 = arith.constant 0 : index
    %c0_49 = arith.constant 0 : index
    %93 = vector.load %arg13[%c0_47, %c2, %c0_48, %c0_49] : memref<1x4x8x8xf32, #tpu.memory_space<vmem>>, vector<1x1x8x8xf32>
    %94 = vector.shape_cast %93 : vector<1x1x8x8xf32> to vector<1x8x8xf32>
    %95 = vector.shape_cast %92 : vector<1x8x8xf32> to vector<1x1x8x8xf32>
    tpu.vector_store %arg13[%c0_47, %c2, %c0_48, %c0_49], %95 {strides = array<i32>} : memref<1x4x8x8xf32, #tpu.memory_space<vmem>>, vector<1x1x8x8xf32>,
    %96 = arith.truncf %92 : vector<1x8x8xf32> to vector<1x8x8xbf16>
    "tpu.trace_start"() <{level = 10 : i32, message = "bqk,bkd->bqd"}> : () -> ()
    %cst_50 = arith.constant dense<0.000000e+00> : vector<1x8x8xf32>
    %97 = tpu.matmul %96, %81, %cst_50 {dimension_numbers = #tpu.dot_dimension_numbers<[2], [1], [1], [2], [0, 0, 0, 1, 1, 2], [0], [0]>} : vector<1x8x8xbf16>, vector<1x8x8xbf16>, vector<1x8x8xf32> -> vector<1x8x8xf32>
    "tpu.trace_stop"() : () -> ()
    %98 = arith.truncf %97 : vector<1x8x8xf32> to vector<1x8x8xbf16>
    %99 = vector.shape_cast %98 : vector<1x8x8xbf16> to vector<8x8xbf16>
    %c2_51 = arith.constant 2 : index
    %c0_52 = arith.constant 0 : index
    %c0_53 = arith.constant 0 : index
    %100 = vector.load %arg9[%c2_51, %c0_52, %c0_53] : memref<4x8x32xbf16, #tpu.memory_space<vmem>>, vector<1x8x32xbf16>
    %101 = vector.shape_cast %100 : vector<1x8x32xbf16> to vector<8x32xbf16>
    %cst_54 = arith.constant dense<0.000000e+00> : vector<8x32xf32>
    %102 = tpu.matmul %99, %101, %cst_54 {dimension_numbers = #tpu.dot_dimension_numbers<[1], [0], [0], [1], [0, 0, 1, 1], [], []>} : vector<8x8xbf16>, vector<8x32xbf16>, vector<8x32xf32> -> vector<8x32xf32>
    %103 = arith.addf %78, %102 : vector<8x32xf32>
    %104 = vector.extract_strided_slice %24 {offsets = [0, 0, 24], sizes = [1, 8, 8], strides = [1, 1, 1]} : vector<1x8x32xbf16> to vector<1x8x8xbf16>
    %105 = vector.extract_strided_slice %26 {offsets = [0, 0, 24], sizes = [1, 8, 8], strides = [1, 1, 1]} : vector<1x8x32xbf16> to vector<1x8x8xbf16>
    %106 = vector.extract_strided_slice %28 {offsets = [0, 0, 24], sizes = [1, 8, 8], strides = [1, 1, 1]} : vector<1x8x32xbf16> to vector<1x8x8xbf16>
    "tpu.trace_start"() <{level = 10 : i32, message = "bqd,bkd->bqk"}> : () -> ()
    %cst_55 = arith.constant dense<0.000000e+00> : vector<1x8x8xf32>
    %107 = tpu.matmul %104, %105, %cst_55 {dimension_numbers = #tpu.dot_dimension_numbers<[2], [2], [1], [1], [0, 0, 0, 1, 1, 1], [0], [0]>} : vector<1x8x8xbf16>, vector<1x8x8xbf16>, vector<1x8x8xf32> -> vector<1x8x8xf32>
    "tpu.trace_stop"() : () -> ()
    %cst_56 = arith.constant dense<0xFF800000> : vector<1x8xf32>
    %108 = vector.multi_reduction <maximumf>, %107, %cst_56 [2] : vector<1x8x8xf32> to vector<1x8xf32>
    %109 = vector.shape_cast %108 : vector<1x8xf32> to vector<1x8x1xf32>
    %110 = vector.broadcast %109 : vector<1x8x1xf32> to vector<1x8x8xf32>
    %111 = arith.subf %107, %110 : vector<1x8x8xf32>
    %112 = math.exp %111 : vector<1x8x8xf32>
    %cst_57 = arith.constant dense<0.000000e+00> : vector<1x8xf32>
    %113 = vector.multi_reduction <add>, %112, %cst_57 [2] : vector<1x8x8xf32> to vector<1x8xf32>
    %114 = vector.shape_cast %113 : vector<1x8xf32> to vector<1x8x1xf32>
    %115 = tpu.reciprocal %114 {approx = true} : vector<1x8x1xf32> -> vector<1x8x1xf32>
    %116 = vector.broadcast %115 : vector<1x8x1xf32> to vector<1x8x8xf32>
    %117 = arith.mulf %112, %116 : vector<1x8x8xf32>
    %c0_58 = arith.constant 0 : index
    %c3 = arith.constant 3 : index
    %c0_59 = arith.constant 0 : index
    %c0_60 = arith.constant 0 : index
    %118 = vector.load %arg13[%c0_58, %c3, %c0_59, %c0_60] : memref<1x4x8x8xf32, #tpu.memory_space<vmem>>, vector<1x1x8x8xf32>
    %119 = vector.shape_cast %118 : vector<1x1x8x8xf32> to vector<1x8x8xf32>
    %120 = vector.shape_cast %117 : vector<1x8x8xf32> to vector<1x1x8x8xf32>
    tpu.vector_store %arg13[%c0_58, %c3, %c0_59, %c0_60], %120 {strides = array<i32>} : memref<1x4x8x8xf32, #tpu.memory_space<vmem>>, vector<1x1x8x8xf32>,
    %121 = arith.truncf %117 : vector<1x8x8xf32> to vector<1x8x8xbf16>
    "tpu.trace_start"() <{level = 10 : i32, message = "bqk,bkd->bqd"}> : () -> ()
    %cst_61 = arith.constant dense<0.000000e+00> : vector<1x8x8xf32>
    %122 = tpu.matmul %121, %106, %cst_61 {dimension_numbers = #tpu.dot_dimension_numbers<[2], [1], [1], [2], [0, 0, 0, 1, 1, 2], [0], [0]>} : vector<1x8x8xbf16>, vector<1x8x8xbf16>, vector<1x8x8xf32> -> vector<1x8x8xf32>
    "tpu.trace_stop"() : () -> ()
    %123 = arith.truncf %122 : vector<1x8x8xf32> to vector<1x8x8xbf16>
    %124 = vector.shape_cast %123 : vector<1x8x8xbf16> to vector<8x8xbf16>
    %c3_62 = arith.constant 3 : index
    %c0_63 = arith.constant 0 : index
    %c0_64 = arith.constant 0 : index
    %125 = vector.load %arg9[%c3_62, %c0_63, %c0_64] : memref<4x8x32xbf16, #tpu.memory_space<vmem>>, vector<1x8x32xbf16>
    %126 = vector.shape_cast %125 : vector<1x8x32xbf16> to vector<8x32xbf16>
    %cst_65 = arith.constant dense<0.000000e+00> : vector<8x32xf32>
    %127 = tpu.matmul %124, %126, %cst_65 {dimension_numbers = #tpu.dot_dimension_numbers<[1], [0], [0], [1], [0, 0, 1, 1], [], []>} : vector<8x8xbf16>, vector<8x32xbf16>, vector<8x32xf32> -> vector<8x32xf32>
    %128 = arith.addf %103, %127 : vector<8x32xf32>
    %cst_66 = arith.constant dense<0.000000e+00> : vector<8xf32>
    %129 = vector.multi_reduction <add>, %128, %cst_66 [1] : vector<8x32xf32> to vector<8xf32>
    %130 = vector.shape_cast %129 : vector<8xf32> to vector<8x1xf32>
    %131 = arith.mulf %128, %128 : vector<8x32xf32>
    %cst_67 = arith.constant dense<0.000000e+00> : vector<8xf32>
    %132 = vector.multi_reduction <add>, %131, %cst_67 [1] : vector<8x32xf32> to vector<8xf32>
    %133 = vector.shape_cast %132 : vector<8xf32> to vector<8x1xf32>
    %cst_68 = arith.constant 3.125000e-02 : f32
    %134 = vector.broadcast %cst_68 : f32 to vector<8x1xf32>
    %135 = arith.mulf %130, %134 : vector<8x1xf32>
    %cst_69 = arith.constant 3.125000e-02 : f32
    %136 = vector.broadcast %cst_69 : f32 to vector<8x1xf32>
    %137 = arith.mulf %133, %136 : vector<8x1xf32>
    %138 = arith.mulf %135, %135 : vector<8x1xf32>
    %139 = arith.subf %137, %138 : vector<8x1xf32>
    %140 = vector.broadcast %135 : vector<8x1xf32> to vector<8x32xf32>
    %141 = arith.subf %128, %140 : vector<8x32xf32>
    %cst_70 = arith.constant 9.99999997E-7 : f32
    %142 = vector.broadcast %cst_70 : f32 to vector<8x1xf32>
    %143 = arith.addf %139, %142 : vector<8x1xf32>
    %144 = math.rsqrt %143 : vector<8x1xf32>
    %145 = vector.broadcast %144 : vector<8x1xf32> to vector<8x32xf32>
    %146 = arith.mulf %141, %145 : vector<8x32xf32>
    %c0_71 = arith.constant 0 : index
    %c0_72 = arith.constant 0 : index
    %147 = vector.load %arg10[%c0_71, %c0_72] : memref<1x32xf32, #tpu.memory_space<vmem>>, vector<1x32xf32>
    %148 = vector.shape_cast %147 : vector<1x32xf32> to vector<32xf32>
    %149 = vector.shape_cast %148 : vector<32xf32> to vector<1x32xf32>
    %150 = vector.broadcast %149 : vector<1x32xf32> to vector<8x32xf32>
    %151 = arith.mulf %146, %150 : vector<8x32xf32>
    %c0_73 = arith.constant 0 : index
    %c0_74 = arith.constant 0 : index
    %152 = vector.load %arg11[%c0_73, %c0_74] : memref<1x32xf32, #tpu.memory_space<vmem>>, vector<1x32xf32>
    %153 = vector.shape_cast %152 : vector<1x32xf32> to vector<32xf32>
    %154 = vector.shape_cast %153 : vector<32xf32> to vector<1x32xf32>
    %155 = vector.broadcast %154 : vector<1x32xf32> to vector<8x32xf32>
    %156 = arith.addf %151, %155 : vector<8x32xf32>
    %157 = vector.shape_cast %156 : vector<8x32xf32> to vector<1x8x32xf32>
    %c0_75 = arith.constant 0 : index
    %c0_76 = arith.constant 0 : index
    %c0_77 = arith.constant 0 : index
    %158 = vector.load %arg12[%c0_75, %c0_76, %c0_77] : memref<1x8x32xf32, #tpu.memory_space<vmem>>, vector<1x8x32xf32>
    tpu.vector_store %arg12[%c0_75, %c0_76, %c0_77], %157 {strides = array<i32>} : memref<1x8x32xf32, #tpu.memory_space<vmem>>, vector<1x8x32xf32>,
    return
  }
  func.func @transform_0(%arg0: i32) -> (i32, i32, i32) {
    %c0_i32 = arith.constant 0 : i32
    %c0_i32_0 = arith.constant 0 : i32
    %c0_i32_1 = arith.constant 0 : i32
    return %arg0, %c0_i32, %c0_i32_0 : i32, i32, i32
  }
  func.func @transform_1(%arg0: i32) -> (i32, i32, i32) {
    %c0_i32 = arith.constant 0 : i32
    %c0_i32_0 = arith.constant 0 : i32
    %c0_i32_1 = arith.constant 0 : i32
    return %arg0, %c0_i32, %c0_i32_0 : i32, i32, i32
  }
  func.func @transform_2(%arg0: i32) -> (i32, i32, i32) {
    %c0_i32 = arith.constant 0 : i32
    %c0_i32_0 = arith.constant 0 : i32
    %c0_i32_1 = arith.constant 0 : i32
    return %arg0, %c0_i32, %c0_i32_0 : i32, i32, i32
  }
  func.func @transform_3(%arg0: i32) -> (i32, i32) {
    %c0_i32 = arith.constant 0 : i32
    %c0_i32_0 = arith.constant 0 : i32
    %c0_i32_1 = arith.constant 0 : i32
    return %c0_i32, %c0_i32_0 : i32, i32
  }
  func.func @transform_4(%arg0: i32) -> (i32, i32) {
    %c0_i32 = arith.constant 0 : i32
    %c0_i32_0 = arith.constant 0 : i32
    %c0_i32_1 = arith.constant 0 : i32
    return %c0_i32, %c0_i32_0 : i32, i32
  }
  func.func @transform_5(%arg0: i32) -> (i32, i32) {
    %c0_i32 = arith.constant 0 : i32
    %c0_i32_0 = arith.constant 0 : i32
    %c0_i32_1 = arith.constant 0 : i32
    return %c0_i32, %c0_i32_0 : i32, i32
  }
  func.func @transform_6(%arg0: i32) -> (i32, i32) {
    %c0_i32 = arith.constant 0 : i32
    %c0_i32_0 = arith.constant 0 : i32
    %c0_i32_1 = arith.constant 0 : i32
    return %c0_i32, %c0_i32_0 : i32, i32
  }
  func.func @transform_7(%arg0: i32) -> (i32, i32) {
    %c0_i32 = arith.constant 0 : i32
    %c0_i32_0 = arith.constant 0 : i32
    %c0_i32_1 = arith.constant 0 : i32
    return %c0_i32, %c0_i32_0 : i32, i32
  }
  func.func @transform_8(%arg0: i32) -> (i32, i32, i32) {
    %c0_i32 = arith.constant 0 : i32
    %c0_i32_0 = arith.constant 0 : i32
    %c0_i32_1 = arith.constant 0 : i32
    %c0_i32_2 = arith.constant 0 : i32
    return %c0_i32, %c0_i32_0, %c0_i32_1 : i32, i32, i32
  }
  func.func @transform_9(%arg0: i32) -> (i32, i32) {
    %c0_i32 = arith.constant 0 : i32
    %c0_i32_0 = arith.constant 0 : i32
    %c0_i32_1 = arith.constant 0 : i32
    return %c0_i32, %c0_i32_0 : i32, i32
  }
  func.func @transform_10(%arg0: i32) -> (i32, i32) {
    %c0_i32 = arith.constant 0 : i32
    %c0_i32_0 = arith.constant 0 : i32
    %c0_i32_1 = arith.constant 0 : i32
    return %c0_i32, %c0_i32_0 : i32, i32
  }
  func.func @transform_11(%arg0: i32) -> (i32, i32, i32) {
    %c0_i32 = arith.constant 0 : i32
    %c0_i32_0 = arith.constant 0 : i32
    %c0_i32_1 = arith.constant 0 : i32
    return %arg0, %c0_i32, %c0_i32_0 : i32, i32, i32
  }
  func.func @transform_12(%arg0: i32) -> (i32, i32, i32, i32) {
    %c0_i32 = arith.constant 0 : i32
    %c0_i32_0 = arith.constant 0 : i32
    %c0_i32_1 = arith.constant 0 : i32
    %c0_i32_2 = arith.constant 0 : i32
    return %arg0, %c0_i32, %c0_i32_0, %c0_i32_1 : i32, i32, i32, i32
  }
}

</mosaic_0001>

<bundles_post_ra>
// kernel: tpu_custom_call.1
= control target key start
LH: loop header
LB: loop body
LE: loop exit
PB: predicated region body
PF: predicated region fallthrough
CT: control target
= control target key end

     0   :  { %s2995_s0 = inlined_call_operand.hbm [shape: f32[2,8,16], index: 0, kind: input, shape index: {}]   ;;  %s2996_s1 = inlined_call_operand.hbm [shape: f32[2,8,32], index: 1, kind: input, shape index: {}]   ;;  %s2997_s2 = inlined_call_operand.hbm [shape: f32[2,8,32], index: 2, kind: input, shape index: {}]   ;;  %s2998_s3 = inlined_call_operand.hbm [shape: bf16[16,32], index: 3, kind: input, shape index: {}]   ;;  %s2999_s4 = inlined_call_operand.vmem [shape: f32[1,32], index: 4, kind: input, shape index: {}]   ;;  %s3000_s5 = inlined_call_operand.vmem [shape: bf16[32,32], index: 5, kind: input, shape index: {}]   ;;  %s3001_s6 = inlined_call_operand.hbm [shape: bf16[32,32], index: 6, kind: input, shape index: {}]   ;;  %s3002_s7 = inlined_call_operand.hbm [shape: bf16[32,32], index: 7, kind: input, shape index: {}]   ;;  %s3003_s8 = inlined_call_operand.hbm [shape: bf16[4,8,32], index: 8, kind: input, shape index: {}]   ;;  %s3004_s9 = inlined_call_operand.vmem [shape: f32[1,32], index: 9, kind: input, shape index: {}]   ;;  %s3005_s10 = inlined_call_operand.vmem [shape: f32[1,32], index: 10, kind: input, shape index: {}]   ;;  %s3006_s11 = inlined_call_operand.hbm [shape: f32[2,8,32], index: 11, kind: output, shape index: {0}]   ;;  %s3007_s12 = inlined_call_operand.hbm [shape: f32[2,4,8,8], index: 12, kind: output, shape index: {1}]  }
   0x1   :  { %3034 = sst [smem:[#allocation29_spill]] %s2996_s1 }
   0x2   :  { %3035 = sst [smem:[#allocation30_spill]] %s2998_s3 }
   0x3   :  { %3036 = sst [smem:[#allocation31_spill]] %s2999_s4 }
   0x4   :  { %3037 = sst [smem:[#allocation32_spill]] %s3002_s7 }
   0x5   :  { %3038 = sst [smem:[#allocation33_spill]] %s3004_s9 }
   0x6   :  { %3039 = sst [smem:[#allocation34_spill]] %s3005_s10 }
   0x7   :  { %3040 = sst [smem:[#allocation35_spill]] %s3006_s11 }
   0x8   :  { %3041 = sst [smem:[#allocation36_spill]] %s3007_s12 }
   0x9   :  { %18 = vsyncpa [#allocation3], 0 }
   0xa   :  { %20 = vsyncpa [#allocation3 + $0x1], 0 }
   0xb   :  { %21 = vsyncpa [#allocation6], 0 }
   0xc   :  { %23 = vsyncpa [#allocation6 + $0x1], 0 }
   0xd   :  { %24 = vsyncpa [#allocation9], 0 }
   0xe   :  { %25 = vsyncpa [#allocation12], 0 }
   0xf   :  { %26 = vsyncpa [#allocation4], 0 }
  0x10   :  { %28 = vsyncpa [#allocation4 + $0x1], 0 }
  0x11   :  { %29 = vsyncpa [#allocation16], 0 }
  0x12   :  { %31 = vsyncpa [#allocation16 + $0x1], 0  ;;  %s2455_s21 = smov 0   ;;  %s2457_s22 = smov 0  }
  0x13   :  { %s2459_s23 = smov 0   ;;  %s2461_s24 = smov 0  }
  0x14 LB: > { %3042 = sst [smem:[#allocation23_spill]] %s2358_s21  ;;  %s2372_s25 = smov [#allocation8]   ;;  %s2370_s24 = sphi %s2461_s24, %s3085_s24   ;;  %s2366_s23 = sphi %s2459_s23, %s3089_s23   ;;  %s2362_s22 = sphi %s2457_s22, %s3088_s22   ;;  %s2358_s21 = sphi %s2455_s21, %s3087_s21  }
  0x15   : > { %3043 = sst [smem:[#allocation24_spill]] %s2370_s24  ;;  %s352_s26 = sshll.u32 %s2372_s25, 4  ;;  %s2481_s26 = int_to_ptr.vmem [resolvable:$true] %s352_s26 }
  0x16   : > { %s2476_s27 = sadd.s32 4294967295, %s2370_s24   ;;  %p1713_p0 = scmp.ge.s32.totalorder %s2370_s24, 1 }
  0x17   : > { %p3020_p1 = scmp.eq.s32.totalorder %s2476_s27, 0  ;;  %p340_p2 = scmp.lt.s32.totalorder %s2370_s24, 3 }
  0x18   : > { %s2373_s29 = smov [#allocation11]   ;;  %s3046_s3 = sld [smem:[#allocation30_spill]] }
  0x19   : > { %p2483_p3 = pnand %p1713_p0, %p340_p2  ;;  %s384_s30 = sshll.u32 %s2373_s29, 4  ;;  %s2496_s30 = int_to_ptr.vmem [resolvable:$true] %s384_s30 }
  0x1b   : > { %s3044_s28 = scalar_select %p2483_p3, 1, 0 }
  0x1c   : > { %p1948_p5 = pneg %p2483_p3 }
  0x1e   : > { %p2492_p6 = pnand %p1948_p5, %p3020_p1  ;;  %s2058_s16 = scalar_lea.hbm %s3046_s3, 128 }
  0x1f   : > { %p2059_p7 = scmp.ne.s32.totalorder %s3046_s3, %s2058_s16  ;;  %p2065_p11 = scmp.lt.u32.totalorder %s2058_s16, %s3046_s3 }
  0x20   : > { %s3045_s13 = scalar_select %p2492_p6, 1, 0 }
  0x21   : > { %p2506_p8 = pneg %p2492_p6 }
  0x23   : > { %s3047_s19 = scalar_select %p2506_p8, 1, 0 }
  0x24   : > { %p2061_p9 = pnand %p2506_p8, %p2059_p7 }
  0x26   : > { %p2062_p10 = pneg %p2061_p9 }
  0x28   : > { %p2067_p12 = pnand %p2065_p11, %p2062_p10 }
  0x2a   : > { %2070 = shalt.err (!%p2067_p12)
}
  0x2b   : > { %s2071_s29 = scalar_lea.vmem %s2481_s26, 128  ;;  %p2079_p5 = scmp.lt.s32.totalorder %s2481_s26, %s2481_s26 }
  0x2c   : > { %p2072_p13 = scmp.ne.s32.totalorder %s2481_s26, %s2071_s29  ;;  %p2080_p4 = scmp.lt.s32.totalorder %s2071_s29, %s2071_s29 }
  0x2e   : > { %p2074_p0 = pnand %p2072_p13, %p2506_p8  ;;  %p2081_p7 = por %p2080_p4, %p2079_p5 }
  0x30   : > { %p2075_p2 = pneg %p2074_p0 }
  0x32   : > { %p2082_p9 = pnand %p2081_p7, %p2075_p2 }
  0x34   : > { %2085 = shalt.err (!%p2082_p9)
}
  0x35   : > { %s3010_s14 = smov 64   ;;  %s3012_s15 = smov 4  }
  0x36   : > { %1951 = dma.hbm_to_vmem [thread:$0]  (!%p2492_p6), %s3046_s3, 128, %s2481_s26, [#allocation9], %s3010_s14, %s3010_s14, %s3012_s15  }
  0x37   : > { %s3048_s7 = sld [smem:[#allocation32_spill]] }
  0x3d   : > { %s2086_s25 = scalar_lea.hbm %s3048_s7, 256 }
  0x3e   : > { %p2087_p4 = scmp.ne.s32.totalorder %s3048_s7, %s2086_s25  ;;  %p2093_p12 = scmp.lt.u32.totalorder %s2086_s25, %s3048_s7 }
  0x40   : > { %p2089_p10 = pnand %p2087_p4, %p2506_p8 }
  0x42   : > { %p2090_p11 = pneg %p2089_p10 }
  0x44   : > { %p2095_p13 = pnand %p2093_p12, %p2090_p11 }
  0x46   : > { %2098 = shalt.err (!%p2095_p13)
}
  0x47   : > { %s2099_s26 = scalar_lea.vmem %s2496_s30, 256  ;;  %p2107_p7 = scmp.lt.s32.totalorder %s2496_s30, %s2496_s30 }
  0x48   : > { %p2100_p0 = scmp.ne.s32.totalorder %s2496_s30, %s2099_s26  ;;  %p2108_p9 = scmp.lt.s32.totalorder %s2099_s26, %s2099_s26 }
  0x4a   : > { %p2102_p2 = pnand %p2100_p0, %p2506_p8  ;;  %p2109_p4 = por %p2108_p9, %p2107_p7 }
  0x4c   : > { %p2103_p5 = pneg %p2102_p2 }
  0x4e   : > { %p2110_p10 = pnand %p2109_p4, %p2103_p5 }
  0x50   : > { %2113 = shalt.err (!%p2110_p10)
}
  0x51   : > { %1957 = dma.hbm_to_vmem [thread:$0]  (!%p2492_p6), %s3048_s7, 256, %s2496_s30, [#allocation12], %s3010_s14, %s3010_s14, %s3012_s15  }
  0x52   : > { %s1712_s11 = sadd.s32 4294967294, %s2370_s24   ;;  %s2558_s16 = sadd.s32 1, %s2370_s24  }
  0x53   : > { %3049 = sst [smem:[#allocation25_spill]] %s2558_s16  ;;  %s41_s17 = ssub.s32 %s2370_s24, %s2558_s16 }
  0x54   : > { %s44_s18 = sadd.s32 1, %s2366_s23  ;;  %p42_p11 = scmp.eq.s32.totalorder %s41_s17, 0 }
  0x55   : > { %p51_p12 = scmp.ne.s32.totalorder %s2366_s23, %s2362_s22  ;;  %p52_p13 = scmp.eq.s32.totalorder %s2370_s24, 0 }
  0x56   : > { %p57_p0 = scmp.ne.s32.totalorder %s2362_s22, %s2358_s21  ;;  %p301_p7 = scmp.eq.s32.totalorder %s2476_s27, 1 }
  0x57   : > { %s2569_s20 = scalar_select %p42_p11, %s2366_s23, %s44_s18  }
  0x58   : > { %p53_p2 = por %p52_p13, %p51_p12  ;;  %p2573_p5 = por %p3020_p1, %p57_p0 }
  0x59   : > { %3050 = sst [smem:[#allocation26_spill]] %s2569_s20  ;;  %p307_p9 = scmp.eq.s32.totalorder %s1712_s11, 1 }
  0x5a   : > { %s3051_s25 = scalar_select %p2573_p5, 1, 0 }
  0x5b   : > { %p1982_p4 = scmp.lt.s32.totalorder %s2370_s24, 2  ;;  %s3014_s30 = sand.u32 1, %s2366_s23  }
  0x5c   : > { %p2580_p10 = por %p301_p7, %p51_p12  ;;  %p2584_p3 = por %p307_p9, %p57_p0 }
  0x5d   : > { %s2590_s9 = sshll.u32 %s3014_s30, 3  ;;  %s2593_s10 = sshll.u32 %s2370_s24, 7 }
  0x5e   : > { %s3052_s29 = scalar_select %p2580_p10, 1, 0 }
  0x5f   : > { %s3054_s26 = scalar_select %p2584_p3, 1, 0 }
  0x60   : > { %3053 = sst [smem:[#allocation27_spill]] %s3052_s29  ;;  %p2595_p11 = pnand %p1982_p4, %p53_p2 }
  0x61   : > { %3055 = sst [smem:[#allocation28_spill]] %s3054_s26  ;;  %s435_s11 = sand.u32 1, %s2370_s24  }
  0x62   : > { %s3056_s17 = scalar_select %p2595_p11, 1, 0 }
  0x63   : > { %s3057_s1 = sld [smem:[#allocation29_spill]]  ;;  %s439_s30 = scalar_lea.vmem [#allocation5], %s2590_s9 }
  0x64   : > { %s446_s3 = sshll.u32 %s439_s30, 4  ;;  %s2376_s7 = smov [#allocation10]   ;;  %s2607_s3 = int_to_ptr.vmem [resolvable:$true] %s446_s3 }
  0x65   : > { %s2609_s20 = sshll.u32 %s2376_s7, 4  ;;  %s2611_s16 = scalar_lea.sflag [#allocation6], %s435_s11  ;;  %s372_s20 = int_to_ptr.vmem [resolvable:$true] %s2609_s20 }
  0x66   : > { %p2617_p13 = pneg %p2595_p11 }
  0x68   : > { %s3058_s14 = scalar_select %p2617_p13, 1, 0 }
  0x69   : > { %s2604_s15 = scalar_lea.hbm %s3057_s1, %s2593_s10  ;;  %s2119_s24 = scalar_lea.hbm %s3057_s1, 256 }
  0x6a   : > { %s2114_s26 = scalar_lea.hbm %s2604_s15, 128  ;;  %p2120_p7 = scmp.lt.u32.totalorder %s2604_s15, %s3057_s1 }
  0x6b   : > { %p2115_p12 = scmp.ne.s32.totalorder %s2604_s15, %s2114_s26  ;;  %p2121_p9 = scmp.lt.u32.totalorder %s2119_s24, %s2114_s26 }
  0x6c   : > { %p2123_p1 = scmp.lt.u32.totalorder %s2114_s26, %s2604_s15 }
  0x6d   : > { %p2117_p0 = pnand %p2617_p13, %p2115_p12  ;;  %p2122_p4 = por %p2121_p9, %p2120_p7 }
  0x6f   : > { %p2118_p2 = pneg %p2117_p0  ;;  %p2124_p3 = por %p2123_p1, %p2122_p4 }
  0x71   : > { %p2125_p10 = pnand %p2124_p3, %p2118_p2 }
  0x73   : > { %2128 = shalt.err (!%p2125_p10)
}
  0x74   : > { %s2129_s11 = scalar_lea.vmem %s2607_s3, 128  ;;  %s2377_s18 = smov [#allocation5]  }
  0x75   : > { %p2130_p12 = scmp.ne.s32.totalorder %s2607_s3, %s2129_s11  ;;  %s2134_s30 = sshll.u32 %s2377_s18, 4  ;;  %s2135_s30 = int_to_ptr.vmem [resolvable:$false] %s2134_s30 }
  0x76   : > { %s2136_s21 = scalar_lea.vmem %s2135_s30, 256  ;;  %p2137_p6 = scmp.lt.s32.totalorder %s2607_s3, %s2135_s30 }
  0x77   : > { %p2132_p0 = pnand %p2130_p12, %p2617_p13  ;;  %p2138_p8 = scmp.lt.s32.totalorder %s2136_s21, %s2129_s11 }
  0x79   : > { %p2133_p5 = pneg %p2132_p0  ;;  %p2139_p7 = por %p2138_p8, %p2137_p6 }
  0x7b   : > { %p2140_p9 = pnand %p2139_p7, %p2133_p5 }
  0x7d   : > { %2143 = shalt.err (!%p2140_p9)
}
  0x7e   : > { %1967 = dma.hbm_to_vmem [thread:$0]  (!%p2595_p11), %s2604_s15, 128, %s2607_s3, %s2611_s16  }
  0x7f   : > { %s2144_s7 = scalar_lea.hbm %s3001_s6, 256  ;;  %p3059_p3 = scmp.ne.s32.totalorder %s3047_s19, 0 }
  0x80   : > { %p2145_p1 = scmp.ne.s32.totalorder %s3001_s6, %s2144_s7  ;;  %p2151_p5 = scmp.lt.u32.totalorder %s2144_s7, %s3001_s6 }
  0x82   : > { %p2147_p6 = pnand %p2145_p1, %p3059_p3 }
  0x84   : > { %p2148_p8 = pneg %p2147_p6 }
  0x86   : > { %p2153_p10 = pnand %p2151_p5, %p2148_p8 }
  0x88   : > { %2156 = shalt.err (!%p2153_p10)
}
  0x89   : > { %s2157_s21 = scalar_lea.vmem %s372_s20, 256  ;;  %p2165_p0 = scmp.lt.s32.totalorder %s372_s20, %s372_s20 }
  0x8a   : > { %p2158_p2 = scmp.ne.s32.totalorder %s372_s20, %s2157_s21  ;;  %p2166_p7 = scmp.lt.s32.totalorder %s2157_s21, %s2157_s21 }
  0x8c   : > { %p2160_p4 = pnand %p2158_p2, %p3059_p3  ;;  %p2167_p9 = por %p2166_p7, %p2165_p0 }
  0x8e   : > { %p2161_p12 = pneg %p2160_p4 }
  0x90   : > { %p2168_p11 = pnand %p2167_p9, %p2161_p12 }
  0x92   : > { %2171 = shalt.err (!%p2168_p11)
}
  0x93   : > { %p3060_p1 = scmp.ne.s32.totalorder %s3045_s13, 0  ;;  %s3061_s1 = smov 4  }
  0x94   : > { %s3062_s3 = smov 64   ;;  %s2378_s26 = smov [#allocation13]  }
  0x95   : > { %1954 = dma.hbm_to_vmem [thread:$0]  (!%p3060_p1), %s3001_s6, 256, %s372_s20, [#allocation9], %s3062_s3, %s3062_s3, %s3061_s1  }
  0x96   : > { %s397_s7 = sshll.u32 %s2378_s26, 4  ;;  %s2172_s30 = scalar_lea.hbm %s3003_s8, 256  ;;  %s398_s7 = int_to_ptr.vmem [resolvable:$true] %s397_s7 }
  0x97   : > { %p2173_p11 = scmp.ne.s32.totalorder %s3003_s8, %s2172_s30  ;;  %p2179_p5 = scmp.lt.u32.totalorder %s2172_s30, %s3003_s8 }
  0x99   : > { %p2175_p6 = pnand %p2173_p11, %p3059_p3 }
  0x9b   : > { %p2176_p8 = pneg %p2175_p6 }
  0x9d   : > { %p2181_p10 = pnand %p2179_p5, %p2176_p8 }
  0x9f   : > { %2184 = shalt.err (!%p2181_p10)
}
  0xa0   : > { %s2185_s20 = scalar_lea.vmem %s398_s7, 256  ;;  %p2193_p0 = scmp.lt.s32.totalorder %s398_s7, %s398_s7 }
  0xa1   : > { %p2186_p2 = scmp.ne.s32.totalorder %s398_s7, %s2185_s20  ;;  %p2194_p7 = scmp.lt.s32.totalorder %s2185_s20, %s2185_s20 }
  0xa3   : > { %p2188_p4 = pnand %p2186_p2, %p3059_p3  ;;  %p2195_p9 = por %p2194_p7, %p2193_p0 }
  0xa5   : > { %p2189_p12 = pneg %p2188_p4 }
  0xa7   : > { %p2196_p13 = pnand %p2195_p9, %p2189_p12 }
  0xa9   : > { %2199 = shalt.err (!%p2196_p13)
}
  0xaa   : > { %1960 = dma.hbm_to_vmem [thread:$0]  (!%p3060_p1), %s3003_s8, 256, %s398_s7, [#allocation12], %s3062_s3, %s3062_s3, %s3061_s1  }
  0xab   : > { %s2688_s15 = scalar_lea.hbm %s2995_s0, %s2593_s10  ;;  %s421_s13 = scalar_lea.vmem [#allocation2], %s2590_s9 }
  0xac   : > { %s428_s24 = sshll.u32 %s421_s13, 4  ;;  %s3063_s26 = sand.u32 1, %s2366_s23   ;;  %s429_s24 = int_to_ptr.vmem [resolvable:$true] %s428_s24 }
  0xad   : > { %s418_s18 = scalar_lea.sflag [#allocation3], %s3063_s26  ;;  %s2200_s11 = scalar_lea.hbm %s2688_s15, 128 }
  0xae   : > { %p2201_p13 = scmp.ne.s32.totalorder %s2688_s15, %s2200_s11  ;;  %p3064_p3 = scmp.ne.s32.totalorder %s3058_s14, 0 }
  0xaf   : > { %s2205_s7 = scalar_lea.hbm %s2995_s0, 256  ;;  %p2206_p1 = scmp.lt.u32.totalorder %s2688_s15, %s2995_s0 }
  0xb0   : > { %p2203_p11 = pnand %p2201_p13, %p3064_p3  ;;  %p2207_p8 = scmp.lt.u32.totalorder %s2205_s7, %s2200_s11 }
  0xb1   : > { %p2209_p10 = scmp.lt.u32.totalorder %s2200_s11, %s2688_s15 }
  0xb2   : > { %p2204_p6 = pneg %p2203_p11  ;;  %p2208_p5 = por %p2207_p8, %p2206_p1 }
  0xb4   : > { %p2210_p2 = por %p2209_p10, %p2208_p5 }
  0xb6   : > { %p2211_p4 = pnand %p2210_p2, %p2204_p6 }
  0xb8   : > { %2214 = shalt.err (!%p2211_p4)
}
  0xb9   : > { %s2215_s20 = scalar_lea.vmem %s429_s24, 128  ;;  %s2379_s4 = smov [#allocation2]  }
  0xba   : > { %p2216_p12 = scmp.ne.s32.totalorder %s429_s24, %s2215_s20  ;;  %s2220_s12 = sshll.u32 %s2379_s4, 4  ;;  %s2221_s12 = int_to_ptr.vmem [resolvable:$false] %s2220_s12 }
  0xbb   : > { %s2222_s19 = scalar_lea.vmem %s2221_s12, 256  ;;  %p2223_p9 = scmp.lt.s32.totalorder %s429_s24, %s2221_s12 }
  0xbc   : > { %p2218_p0 = pnand %p2216_p12, %p3064_p3  ;;  %p2224_p13 = scmp.lt.s32.totalorder %s2222_s19, %s2215_s20 }
  0xbe   : > { %p2219_p7 = pneg %p2218_p0  ;;  %p2225_p11 = por %p2224_p13, %p2223_p9 }
  0xc0   : > { %p2226_p1 = pnand %p2225_p11, %p2219_p7 }
  0xc2   : > { %2229 = shalt.err (!%p2226_p1)
}
  0xc3   : > { %p3065_p8 = scmp.ne.s32.totalorder %s3056_s17, 0  ;;  %s2714_s26 = scalar_lea.hbm %s2997_s2, %s2593_s10 }
  0xc4   : > { %s457_s11 = scalar_lea.vmem [#allocation7], %s2590_s9  ;;  %s2230_s3 = scalar_lea.hbm %s2714_s26, 128 }
  0xc5   : > { %1964 = dma.hbm_to_vmem [thread:$0]  (!%p3065_p8), %s2688_s15, 128, %s429_s24, %s418_s18  }
  0xc6   : > { %s464_s1 = sshll.u32 %s457_s11, 4  ;;  %p2231_p6 = scmp.ne.s32.totalorder %s2714_s26, %s2230_s3  ;;  %s465_s1 = int_to_ptr.vmem [resolvable:$true] %s464_s1 }
  0xc7   : > { %s2235_s15 = scalar_lea.hbm %s2997_s2, 256  ;;  %p2236_p2 = scmp.lt.u32.totalorder %s2714_s26, %s2997_s2 }
  0xc8   : > { %p2233_p5 = pnand %p2231_p6, %p3064_p3  ;;  %p2237_p4 = scmp.lt.u32.totalorder %s2235_s15, %s2230_s3 }
  0xc9   : > { %p2239_p0 = scmp.lt.u32.totalorder %s2230_s3, %s2714_s26 }
  0xca   : > { %p2234_p10 = pneg %p2233_p5  ;;  %p2238_p12 = por %p2237_p4, %p2236_p2 }
  0xcc   : > { %p2240_p7 = por %p2239_p0, %p2238_p12 }
  0xce   : > { %p2241_p9 = pnand %p2240_p7, %p2234_p10 }
  0xd0   : > { %2244 = shalt.err (!%p2241_p9)
}
  0xd1   : > { %s2245_s9 = scalar_lea.vmem %s465_s1, 128  ;;  %s2380_s10 = smov [#allocation7]  }
  0xd2   : > { %p2246_p13 = scmp.ne.s32.totalorder %s465_s1, %s2245_s9  ;;  %s2250_s21 = sshll.u32 %s2380_s10, 4  ;;  %s2251_s21 = int_to_ptr.vmem [resolvable:$false] %s2250_s21 }
  0xd3   : > { %s2252_s20 = scalar_lea.vmem %s2251_s21, 256  ;;  %p2253_p6 = scmp.lt.s32.totalorder %s465_s1, %s2251_s21 }
  0xd4   : > { %p2248_p11 = pnand %p2246_p13, %p3064_p3  ;;  %p2254_p5 = scmp.lt.s32.totalorder %s2252_s20, %s2245_s9 }
  0xd6   : > { %p2249_p1 = pneg %p2248_p11  ;;  %p2255_p8 = por %p2254_p5, %p2253_p6 }
  0xd8   : > { %p2256_p2 = pnand %p2255_p8, %p2249_p1 }
  0xda   : > { %2259 = shalt.err (!%p2256_p2)
}
  0xdb   : > { %p3066_p4 = scmp.ne.s32.totalorder %s3056_s17, 0  ;;  %p3067_p10 = scmp.ne.s32.totalorder %s3044_s28, 0 }
  0xdc   : > { %s2738_s14 = sand.u32 (!%p3067_p10), 1, %s2362_s22   ;;  %p3068_p3 = scmp.ne.s32.totalorder (!%p3067_p10), %s3051_s25, 0 }
  0xdd   : > { %1970 = dma.hbm_to_vmem [thread:$0]  (!%p3066_p4), %s2714_s26, 128, %s465_s1, %s2611_s16  }
  0xde   : > { %473 = sbr.rel (%p3067_p10) target bundleno = 2893 (0xb4d), region = 64  ;;  %s2741_s4 = sshll.u32 (!%p3067_p10), %s2738_s14, 3 }
  0xdf   : > { %s476_s12 = scalar_lea.sflag (!%p3067_p10), [#allocation3], %s2738_s14  ;;  %s479_s19 = scalar_lea.vmem (!%p3067_p10), [#allocation2], %s2741_s4 }
  0xe5   : > { %2333 = dma.done.wait (%p3068_p3), %s476_s12, 128  }
  0xe6   : > { %2335 = vsyncadd (%p3068_p3), %s476_s12, 4294967168  ;;  %s484_s28 = sand.u32 1, %s2476_s27   ;;  %s488_s17 = scalar_lea.vmem [#allocation5], %s2741_s4 }
  0xe7   : > { %s485_s16 = scalar_lea.sflag [#allocation6], %s484_s28 }
  0xe8   : > { %2337 = dma.done.wait (%p3068_p3), %s485_s16, 256  }
  0xe9   : > { %2339 = vsyncadd (%p3068_p3), %s485_s16, 4294967040  ;;  %s497_s29 = scalar_lea.vmem [#allocation7], %s2741_s4  ;;  %p3069_p8 = scmp.eq.s32.totalorder %s2476_s27, 0 }
  0xeb   : > { %2341 = dma.done.wait (%p3069_p8), [#allocation9], 384   ;;  %p3070_p12 = pmov %p3069_p8 }
  0xec   : > { %p3071_p0 = pmov %p3069_p8 }
  0xed   : > { %2343 = vsyncadd (%p3070_p12), [#allocation9], 4294966912 }
  0xee   : > { %2345 = dma.done.wait (%p3071_p0), [#allocation12], 512   ;;  %p3072_p7 = pmov %p3071_p0 }
  0xef   : > { %v2381_v0 = vmov 0.0   ;;  %vm2382_vm0 = vmmov 0   ;;  %v2033_v1 = vld [vmem:[#allocation8] sm:$0xff]   ;;  %v570_v2 = vld [vmem:[%s479_s19] sm:$0xff]  ;;  %vm591_vm1 = vcmask 130048   ;;  %v2034_v4 = vld [vmem:[#allocation10] sm:$0xff]  }
  0xf0   : > { %2347 = vsyncadd (%p3072_p7), [#allocation12], 4294966784  ;;  %1807 = vmatprep.subr.bf16.mxu1 %v2381_v0  ;;  %1809 = vmatprep.mubr.msk.bf16.mxu1 %vm2382_vm0, %v2381_v0  ;;  %v571_v3 = vpack.c.bf16 %v570_v2, %v570_v2  ;;  %v2035_v5 = vld [vmem:[#allocation10 + $0x8] sm:$0xff]   ;;  %v572_v6 = vld [vmem:[%s488_s17] sm:$0xff]  ;;  %vm652_vm2 = vcmask 261120   ;;  %s3073_s7 = sld [smem:[#allocation31_spill]] }
  0xf1   : > { %1821 = vmatprep.subr.bf16.mxu0 %v2381_v0  ;;  %1825 = vmatprep.mubr.msk.bf16.mxu0 %vm2382_vm0, %v2381_v0  ;;  %v2036_v7 = vld [vmem:[%s3000_s5] sm:$0xff]   ;;  %v573_v8 = vpack.c.bf16 %v572_v6, %v572_v6  ;;  %v2037_v9 = vld [vmem:[%s3000_s5 + $0x8] sm:$0xff]   ;;  %vm817_vm3 = vcmask 64512   ;;  %s2383_s30 = smov 120   ;;  %s2384_s15 = smov 112   ;;  %v2039_v29 = vld [vmem:[#allocation11 + $0x8] sm:$0xff]  }
  0xf2   : > { %1808 = vmatpush3.bf16.msra.mxu1 %v2033_v1  ;;  %1822 = vmatpush3.bf16.msra.mxu0 %v2034_v4  ;;  %v2038_v28 = vld [vmem:[#allocation11] sm:$0xff]   ;;  %vm880_vm4 = vcmask 1043456   ;;  %s1734_s24 = sshll.u32 %s2738_s14, 5  ;;  %v925_v58 = vld [vmem:[#allocation13] sm:$0xf]  ;;  %s2385_s9 = smov 104  }
  0xf3   : > { %1813 = vmatprep.subr.bf16.mxu1 %v2381_v0  ;;  %1823 = vmatprep.subr.bf16.mxu0 %v2381_v0  ;;  %v574_v30 = vld [vmem:[%s497_s29] sm:$0xff]  ;;  %s2830_s18 = scalar_lea.vmem [#allocation15], %s1734_s24  ;;  %v930_v59 = vsel %vm880_vm4, %v925_v58, 0  ;;  %s3074_s10 = sld [smem:[#allocation27_spill]] }
  0xf4   : > { %v575_v31 = vpack.c.bf16 %v574_v30, %v574_v30  ;;  %s1771_s21 = sshll.u32 %s2476_s27, 9  ;;  %s1526_s20 = sshll.u32 %s2830_s18, 4  ;;  %s2913_s20 = int_to_ptr.vmem [resolvable:$true] %s1526_s20 }
  0xf5   : > { %1810 = vmatmul.mubr.msk.bf16.vlgmr.msra.gmra.mrb[0].mxu1 %vm591_vm1, %v571_v3  ;;  %s3075_s28 = sld [smem:[#allocation36_spill]]  ;;  %s1500_s17 = scalar_lea.sflag [#allocation16], %s2738_s14 }
  0xf6   : > { %1814 = vmatpush3.bf16.msra.mxu1 %v2036_v7  ;;  %1817 = vmatprep.mubr.msk.bf16.mxu1 %vm2382_vm0, %v2381_v0  ;;  %v1735_v10 = vld [vmem:[%s3073_s7] ss:$0 sm:$0xff]  ;;  %s2260_s29 = scalar_lea.vmem %s2913_s20, 512  ;;  %s2386_s25 = smov [#allocation15]  }
  0xf7   : > { %1815 = vmatprep.subr.bf16.mxu1 %v2381_v0  ;;  %1824 = vmatpush3.bf16.msra.mxu0 %v2035_v5  ;;  %p2261_p9 = scmp.ne.s32.totalorder %s2913_s20, %s2260_s29  ;;  %s2264_s13 = sshll.u32 %s2386_s25, 4  ;;  %s2265_s13 = int_to_ptr.vmem [resolvable:$false] %s2264_s13 }
  0xf8   : > { %1837 = vmatprep.subr.bf16.mxu0 %v2381_v0  ;;  %s2266_s26 = scalar_lea.vmem %s2265_s13, 1024  ;;  %p2267_p6 = scmp.lt.s32.totalorder %s2913_s20, %s2265_s13 }
  0xf9   : > { %p3076_p13 = scmp.ne.s32.totalorder %s3074_s10, 0  ;;  %p2268_p5 = scmp.lt.s32.totalorder %s2266_s26, %s2260_s29 }
  0xfa   : > { %1826 = vmatmul.mubr.msk.bf16.vlgmr.msra.gmra.mrb[0].mxu0 %vm652_vm2, %v573_v8  ;;  %1816 = vmatpush3.bf16.msra.mxu1 %v2037_v9 }
  0xfb   : > { %1839 = vmatprep.mubr.msk.bf16.mxu0 %vm2382_vm0, %v2381_v0  ;;  %1829 = vmatprep.subr.bf16.mxu1 %v2381_v0  ;;  %s2911_s16 = scalar_lea.hbm %s3075_s28, %s1771_s21  ;;  %p2262_p11 = pnand %p2261_p9, %p3076_p13 }
  0xfc   : > { %p2269_p2 = por %p2268_p5, %p2267_p6 }
  0xfd   : > { %p2263_p1 = pneg %p2262_p11 }
  0xff   : > { %p2270_p4 = pnand %p2269_p2, %p2263_p1 }
 0x1c8   : > { %v629_v11 = vpop.f32.mrb[0].mxu1 }
 0x1c9   : > { %v2789_v12 = vadd.f32 %v1735_v10, %v629_v11  ;;  %v1811_v13 = vpop.f32.mrb[1].mxu1 }
 0x1ca   : > { %v632_v14 = vpop.f32.mrb[2].mxu1 }
 0x1cb   : > { %v635_v15 = vpack.c.bf16 %v2789_v12, %v2789_v12  ;;  %v1812_v16 = vpop.f32.mrb[3].mxu1 }
 0x1cd   : > { %1818 = vmatmul.mubr.msk.bf16.vlgmr.msra.gmra.mrb[4].mxu1 %vm652_vm2, %v635_v15  ;;  %v749_v17 = vpop.f32.mrb[0].mxu0 }
 0x1ce   : > { %1833 = vmatprep.mubr.msk.bf16.mxu1 %vm2382_vm0, %v2381_v0  ;;  %v2796_v18 = vpack.c.bf16 %v749_v17, %v749_v17  ;;  %v1827_v19 = vpop.f32.mrb[1].mxu0  ;;  %1830 = vmatpush3.bf16.msra.mxu1 %v2038_v28 }
 0x1cf   : > { %v752_v20 = vpop.f32.mrb[2].mxu0  ;;  %1831 = vmatprep.subr.bf16.mxu1 %v2381_v0 }
 0x1d0   : > { %v1828_v21 = vpop.f32.mrb[3].mxu0  ;;  %977 = vrot.lane.b32.xlu1 %v2796_v18, %s2383_s30  ;;  %v822_v22 = vsel %vm817_vm3, %v2796_v18, 0 }
 0x1d1   : > { %1838 = vmatpush3.bf16.xpose.msra.mxu0 %v822_v22 }
 0x1d2   : > { %1849 = vmatprep.subr.bf16.mxu0 %v2381_v0  ;;  %1832 = vmatpush3.bf16.msra.mxu1 %v2039_v29 }
 0x1d3   : > { %1843 = vmatprep.subr.bf16.mxu1 %v2381_v0 }
 0x1d5   : > { %1834 = vmatmul.mubr.msk.bf16.vlgmr.msra.gmra.mrb[8].mxu1 %vm652_vm2, %v575_v31 }
 0x1d6   : > { %1845 = vmatprep.mubr.msk.bf16.mxu1 %vm2382_vm0, %v2381_v0 }
 0x242   : > { %v978_v51 = vpop.permute.xlu1 %977 }
 0x243   : > { %v983_v53 = vsel %vm817_vm3, %v978_v51, 0 }
 0x2a0   : > { %v690_v23 = vpop.f32.mrb[4].mxu1 }
 0x2a1   : > { %v2803_v24 = vpack.c.bf16 %v690_v23, %v690_v23  ;;  %v1819_v25 = vpop.f32.mrb[5].mxu1 }
 0x2a2   : > { %v693_v26 = vpop.f32.mrb[6].mxu1 }
 0x2a3   : > { %974 = vrot.lane.b32.xlu1 %v2803_v24, %s2383_s30  ;;  %v1820_v27 = vpop.f32.mrb[7].mxu1  ;;  %1840 = vmatmul.mubr.msk.bf16.vlgmr.msra.gmra.mrb[4].mxu0 %vm817_vm3, %v2803_v24 }
 0x2a4   : > { %1851 = vmatprep.mubr.msk.bf16.mxu0 %vm2382_vm0, %v2381_v0  ;;  %1850 = vmatpush3.bf16.msra.mxu0 %v930_v59 }
 0x2a5   : > { %1861 = vmatprep.subr.bf16.mxu0 %v2381_v0 }
 0x2a7   : > { %1138 = vrot.lane.b32.xlu1 %v2803_v24, %s2384_s15 }
 0x2a8   : > { %v808_v42 = vpop.f32.mrb[8].mxu1 }
 0x2a9   : > { %v1835_v43 = vpop.f32.mrb[9].mxu1  ;;  %v2822_v45 = vpack.c.bf16 %v808_v42, %v808_v42 }
 0x2aa   : > { %v811_v44 = vpop.f32.mrb[10].mxu1 }
 0x2ab   : > { %v1836_v46 = vpop.f32.mrb[11].mxu1  ;;  %v882_v47 = vsel %vm880_vm4, %v2822_v45, 0 }
 0x2ac   : > { %1844 = vmatpush3.bf16.msra.mxu1 %v882_v47 }
 0x2ad   : > { %1855 = vmatprep.subr.bf16.mxu1 %v2381_v0 }
 0x315   : > { %v975_v55 = vpop.permute.xlu1 %974 }
 0x319   : > { %v1139_v57 = vpop.permute.xlu1 %1138 }
 0x376   : > { %v858_v32 = vpop.f32.mrb[4].mxu0 }
 0x377   : > { %v1841_v33 = vpop.f32.mrb[5].mxu0  ;;  %v864_v34 = vsel %vm817_vm3, %v858_v32, -inf }
 0x378   : > { %865 = vmax.xlane.f32.xlu0 %v864_v34  ;;  %v861_v35 = vpop.f32.mrb[6].mxu0 }
 0x379   : > { %v1842_v36 = vpop.f32.mrb[7].mxu0 }
 0x405   : > { %v866_v37 = vpop.xlane.xlu0 %865 }
 0x406   : > { %v867_v38 = vsub.f32 %v858_v32, %v866_v37 }
 0x408   : > { %v868_v39 = vmul.f32 1.442695, %v867_v38  ;;  %v1090_v38 = vld [vmem:[#allocation13 + $0x4] sm:$0xf] }
 0x40a   : > { %2040 = vpow2.f32 %v868_v39  ;;  %v1095_v39 = vsel %vm880_vm4, %v1090_v38, 0 }
 0x414   : > { %v2041_v40 = vpop.eup %2040 }
 0x415   : > { %v870_v41 = vsel %vm817_vm3, %v2041_v40, 0.0 }
 0x416   : > { %871 = vadd.xlane.f32.xlu0 %v870_v41 }
 0x42c   : > { %1140 = vrot.lane.b32.xlu0 %v2796_v18, %s2384_s15 }
 0x4a3   : > { %v872_v48 = vpop.xlane.xlu0 %871 }
 0x4a4   : > { %2042 = vrcp.f32 %v872_v48 }
 0x4a7   : > { %v1141_v54 = vpop.permute.xlu0 %1140 }
 0x4a8   : > { %v1146_v56 = vsel %vm817_vm3, %v1141_v54, 0 }
 0x4ae   : > { %v2043_v49 = vpop.eup %2042 }
 0x4af   : > { %v874_v50 = vmul.f32 %v2043_v49, %v2041_v40 }
 0x4b1   : > { %875 = vst.msk [vmem:[%s2830_s18] sm:$0xff] %vm817_vm3, %v874_v50  ;;  %v876_v52 = vpack.c.bf16 %v874_v50, %v874_v50  ;;  %v1252_v50 = vld [vmem:[#allocation13 + $0x8] sm:$0xf] }
 0x4b2   : > { %v1257_v54 = vsel %vm880_vm4, %v1252_v50, 0 }
 0x4b3   : > { %1846 = vmatmul.mubr.msk.bf16.vlgmr.msra.gmra.mrb[12].mxu1 %vm817_vm3, %v876_v52 }
 0x4b4   : > { %1856 = vmatpush3.bf16.xpose.msra.mxu1 %v983_v53  ;;  %1857 = vmatprep.mubr.msk.bf16.mxu1 %vm2382_vm0, %v2381_v0 }
 0x4b5   : > { %1873 = vmatprep.subr.bf16.mxu1 %v2381_v0 }
 0x4bb   : > { %1858 = vmatmul.mubr.msk.bf16.vlgmr.msra.gmra.mrb[16].mxu1 %vm817_vm3, %v975_v55 }
 0x4bc   : > { %1874 = vmatpush3.bf16.xpose.msra.mxu1 %v1146_v56  ;;  %1875 = vmatprep.mubr.msk.bf16.mxu1 %vm2382_vm0, %v2381_v0 }
 0x4bd   : > { %1879 = vmatprep.subr.bf16.mxu1 %v2381_v0 }
 0x4c3   : > { %1876 = vmatmul.mubr.msk.bf16.vlgmr.msra.gmra.mrb[20].mxu1 %vm817_vm3, %v1139_v57 }
 0x4c4   : > { %1881 = vmatprep.mubr.msk.bf16.mxu1 %vm2382_vm0, %v2381_v0 }
 0x586   : > { %v918_v60 = vpop.f32.mrb[12].mxu1 }
 0x587   : > { %v924_v61 = vpack.c.bf16 %v918_v60, %v918_v60  ;;  %v1847_v62 = vpop.f32.mrb[13].mxu1 }
 0x588   : > { %v921_v63 = vpop.f32.mrb[14].mxu1 }
 0x589   : > { %v1848_v1 = vpop.f32.mrb[15].mxu1  ;;  %1852 = vmatmul.mubr.msk.bf16.vlgmr.msra.gmra.mrb[8].mxu0 %vm817_vm3, %v924_v61 }
 0x58a   : > { %1863 = vmatprep.mubr.msk.bf16.mxu0 %vm2382_vm0, %v2381_v0 }
 0x58e   : > { %v1019_v2 = vpop.f32.mrb[16].mxu1 }
 0x58f   : > { %v1859_v3 = vpop.f32.mrb[17].mxu1  ;;  %v1025_v11 = vsel %vm817_vm3, %v1019_v2, -inf }
 0x590   : > { %v1022_v4 = vpop.f32.mrb[18].mxu1 }
 0x591   : > { %v1860_v5 = vpop.f32.mrb[19].mxu1  ;;  %v1414_v4 = vld [vmem:[#allocation13 + $0xc] sm:$0xf] }
 0x596   : > { %v1182_v6 = vpop.f32.mrb[20].mxu1 }
 0x597   : > { %v1877_v7 = vpop.f32.mrb[21].mxu1  ;;  %v1188_v8 = vsel %vm817_vm3, %v1182_v6, -inf }
 0x598   : > { %1189 = vmax.xlane.f32.xlu1 %v1188_v8  ;;  %v1185_v9 = vpop.f32.mrb[22].mxu1  ;;  %v1419_v7 = vsel %vm880_vm4, %v1414_v4, 0 }
 0x599   : > { %v1878_v10 = vpop.f32.mrb[23].mxu1 }
 0x5a9   : > { %1202 = vrot.lane.b32.xlu1 %v2822_v45, %s2384_s15 }
 0x5ad   : > { %1300 = vrot.lane.b32.xlu1 %v2803_v24, %s2385_s9 }
 0x5d1   : > { %1026 = vmax.xlane.f32.xlu1 %v1025_v11 }
 0x5e2   : > { %1040 = vrot.lane.b32.xlu1 %v2822_v45, %s2383_s30 }
 0x625   : > { %v1190_v13 = vpop.xlane.xlu1 %1189 }
 0x626   : > { %v1191_v14 = vsub.f32 %v1182_v6, %v1190_v13 }
 0x628   : > { %v1192_v15 = vmul.f32 1.442695, %v1191_v14 }
 0x629   : > { %v1203_v16 = vpop.permute.xlu1 %1202 }
 0x62a   : > { %2044 = vpow2.f32 %v1192_v15  ;;  %v1208_v17 = vsel %vm880_vm4, %v1203_v16, 0 }
 0x62b   : > { %1880 = vmatpush3.bf16.msra.mxu1 %v1208_v17 }
 0x62c   : > { %1891 = vmatprep.subr.bf16.mxu1 %v2381_v0 }
 0x62d   : > { %v1301_v21 = vpop.permute.xlu1 %1300 }
 0x634   : > { %v2045_v19 = vpop.eup %2044 }
 0x635   : > { %v1194_v20 = vsel %vm817_vm3, %v2045_v19, 0.0 }
 0x636   : > { %1195 = vadd.xlane.f32.xlu0 %v1194_v20 }
 0x64c   : > { %1302 = vrot.lane.b32.xlu0 %v2796_v18, %s2385_s9 }
 0x65e   : > { %v1027_v22 = vpop.xlane.xlu1 %1026 }
 0x65f   : > { %v1028_v23 = vsub.f32 %v1019_v2, %v1027_v22 }
 0x661   : > { %v1029_v24 = vmul.f32 1.442695, %v1028_v23 }
 0x662   : > { %v1041_v25 = vpop.permute.xlu1 %1040 }
 0x663   : > { %2046 = vpow2.f32 %v1029_v24  ;;  %v1046_v26 = vsel %vm880_vm4, %v1041_v25, 0 }
 0x664   : > { %1862 = vmatpush3.bf16.msra.mxu0 %v1046_v26 }
 0x665   : > { %1867 = vmatprep.subr.bf16.mxu0 %v2381_v0 }
 0x66d   : > { %v2047_v27 = vpop.eup %2046 }
 0x66e   : > { %v1031_v28 = vsel %vm817_vm3, %v2047_v27, 0.0 }
 0x66f   : > { %1032 = vadd.xlane.f32.xlu0 %v1031_v28 }
 0x6c3   : > { %v1196_v29 = vpop.xlane.xlu0 %1195 }
 0x6c4   : > { %2048 = vrcp.f32 %v1196_v29 }
 0x6c7   : > { %v1303_v31 = vpop.permute.xlu0 %1302 }
 0x6c8   : > { %v1308_v33 = vsel %vm817_vm3, %v1303_v31, 0 }
 0x6ce   : > { %v2049_v18 = vpop.eup %2048 }
 0x6cf   : > { %v1198_v30 = vmul.f32 %v2049_v18, %v2045_v19 }
 0x6d1   : > { %1755 = vst.msk [vmem:[%s2830_s18 + $0x10] sm:$0xff] %vm817_vm3, %v1198_v30  ;;  %v1201_v32 = vpack.c.bf16 %v1198_v30, %v1198_v30 }
 0x6d3   : > { %1882 = vmatmul.mubr.msk.bf16.vlgmr.msra.gmra.mrb[24].mxu1 %vm817_vm3, %v1201_v32 }
 0x6d4   : > { %1892 = vmatpush3.bf16.xpose.msra.mxu1 %v1308_v33  ;;  %1893 = vmatprep.mubr.msk.bf16.mxu1 %vm2382_vm0, %v2381_v0 }
 0x6db   : > { %1894 = vmatmul.mubr.msk.bf16.vlgmr.msra.gmra.mrb[28].mxu1 %vm817_vm3, %v1301_v21 }
 0x6fc   : > { %v1033_v34 = vpop.xlane.xlu0 %1032 }
 0x6fd   : > { %2050 = vrcp.f32 %v1033_v34 }
 0x707   : > { %v2051_v35 = vpop.eup %2050 }
 0x708   : > { %v1035_v36 = vmul.f32 %v2051_v35, %v2047_v27 }
 0x70a   : > { %1751 = vst.msk [vmem:[%s2830_s18 + $0x8] sm:$0xff] %vm817_vm3, %v1035_v36  ;;  %v1038_v37 = vpack.c.bf16 %v1035_v36, %v1035_v36 }
 0x70c   : > { %1864 = vmatmul.mubr.msk.bf16.vlgmr.msra.gmra.mrb[12].mxu0 %vm817_vm3, %v1038_v37 }
 0x70d   : > { %1869 = vmatprep.mubr.msk.bf16.mxu0 %vm2382_vm0, %v2381_v0  ;;  %1868 = vmatpush3.bf16.msra.mxu0 %v1095_v39 }
 0x70e   : > { %1885 = vmatprep.subr.bf16.mxu0 %v2381_v0 }
 0x7a6   : > { %v1244_v40 = vpop.f32.mrb[24].mxu1 }
 0x7a7   : > { %v1883_v41 = vpop.f32.mrb[25].mxu1  ;;  %v1250_v57 = vpack.c.bf16 %v1244_v40, %v1244_v40 }
 0x7a8   : > { %v1247_v42 = vpop.f32.mrb[26].mxu1 }
 0x7a9   : > { %v1884_v43 = vpop.f32.mrb[27].mxu1 }
 0x7ae   : > { %v1344_v44 = vpop.f32.mrb[28].mxu1 }
 0x7af   : > { %v1895_v46 = vpop.f32.mrb[29].mxu1  ;;  %v1350_v47 = vsel %vm817_vm3, %v1344_v44, -inf }
 0x7b0   : > { %1351 = vmax.xlane.f32.xlu0 %v1350_v47  ;;  %v1347_v48 = vpop.f32.mrb[30].mxu1 }
 0x7b1   : > { %v1896_v49 = vpop.f32.mrb[31].mxu1 }
 0x7df   : > { %v1082_v51 = vpop.f32.mrb[12].mxu0 }
 0x7e0   : > { %v1088_v52 = vpack.c.bf16 %v1082_v51, %v1082_v51  ;;  %v1865_v53 = vpop.f32.mrb[13].mxu0 }
 0x7e1   : > { %v1085_v55 = vpop.f32.mrb[14].mxu0 }
 0x7e2   : > { %v1866_v56 = vpop.f32.mrb[15].mxu0  ;;  %1870 = vmatmul.mubr.msk.bf16.vlgmr.msra.gmra.mrb[8].mxu0 %vm817_vm3, %v1088_v52 }
 0x7e3   : > { %1886 = vmatpush3.bf16.msra.mxu0 %v1257_v54  ;;  %1887 = vmatprep.mubr.msk.bf16.mxu0 %vm2382_vm0, %v2381_v0 }
 0x7e4   : > { %1897 = vmatprep.subr.bf16.mxu0 %v2381_v0 }
 0x7ee   : > { %1888 = vmatmul.mubr.msk.bf16.vlgmr.msra.gmra.mrb[8].mxu0 %vm817_vm3, %v1250_v57 }
 0x7ef   : > { %1899 = vmatprep.mubr.msk.bf16.mxu0 %vm2382_vm0, %v2381_v0 }
 0x83d   : > { %v1352_v58 = vpop.xlane.xlu0 %1351 }
 0x83e   : > { %v1353_v59 = vsub.f32 %v1344_v44, %v1352_v58 }
 0x840   : > { %v1354_v60 = vmul.f32 1.442695, %v1353_v59 }
 0x842   : > { %2052 = vpow2.f32 %v1354_v60 }
 0x84c   : > { %v2053_v61 = vpop.eup %2052 }
 0x84d   : > { %v1356_v62 = vsel %vm817_vm3, %v2053_v61, 0.0 }
 0x84e   : > { %1357 = vadd.xlane.f32.xlu0 %v1356_v62 }
 0x864   : > { %1364 = vrot.lane.b32.xlu0 %v2822_v45, %s2385_s9 }
 0x8db   : > { %v1358_v63 = vpop.xlane.xlu0 %1357 }
 0x8dc   : > { %2054 = vrcp.f32 %v1358_v63 }
 0x8df   : > { %v1365_v1 = vpop.permute.xlu0 %1364 }
 0x8e0   : > { %v1370_v2 = vsel %vm880_vm4, %v1365_v1, 0 }
 0x8e1   : > { %1898 = vmatpush3.bf16.msra.mxu0 %v1370_v2 }
 0x8e2   : > { %1903 = vmatprep.subr.bf16.mxu0 %v2381_v0 }
 0x8e6   : > { %v2055_v3 = vpop.eup %2054 }
 0x8e7   : > { %v1360_v5 = vmul.f32 %v2055_v3, %v2053_v61 }
 0x8e9   : > { %1759 = vst.msk [vmem:[%s2830_s18 + $0x18] sm:$0xff] %vm817_vm3, %v1360_v5  ;;  %v1363_v6 = vpack.c.bf16 %v1360_v5, %v1360_v5 }
 0x8eb   : > { %1900 = vmatmul.mubr.msk.bf16.vlgmr.msra.gmra.mrb[16].mxu0 %vm817_vm3, %v1363_v6 }
 0x8ec   : > { %1904 = vmatpush3.bf16.msra.mxu0 %v1419_v7  ;;  %1905 = vmatprep.mubr.msk.bf16.mxu0 %vm2382_vm0, %v2381_v0 }
 0x9be   : > { %v1406_v45 = vpop.f32.mrb[16].mxu0 }
 0x9bf   : > { %v1412_v8 = vpack.c.bf16 %v1406_v45, %v1406_v45  ;;  %v1901_v9 = vpop.f32.mrb[17].mxu0 }
 0x9c0   : > { %v1409_v10 = vpop.f32.mrb[18].mxu0 }
 0x9c1   : > { %v1902_v11 = vpop.f32.mrb[19].mxu0  ;;  %1906 = vmatmul.mubr.msk.bf16.vlgmr.msra.gmra.mrb[8].mxu0 %vm817_vm3, %v1412_v8 }
 0xa94   : > { %v1455_v13 = vpop.f32.mrb[8].mxu0 }
 0xa95   : > { %v1909_v14 = vadd.f32 %v1455_v13, %v2789_v12  ;;  %v1907_v15 = vpop.f32.mrb[9].mxu0 }
 0xa96   : > { %v1458_v16 = vpop.f32.mrb[10].mxu0 }
 0xa97   : > { %v1908_v17 = vpop.f32.mrb[11].mxu0  ;;  %v1462_v19 = vsel %vm652_vm2, %v1909_v14, 0.0  ;;  %v1465_v0 = vmul.f32 %v1909_v14, %v1909_v14 }
 0xa98   : > { %1463 = vadd.xlane.f32.xlu1 %v1462_v19 }
 0xa99   : > { %v1466_v20 = vsel %vm652_vm2, %v1465_v0, 0.0 }
 0xa9a   : > { %1467 = vadd.xlane.f32.xlu0 %v1466_v20 }
 0xa9b   : > { %2273 = shalt.err (!%p2270_p4)
}
 0xa9c   : > { %s2274_s11 = scalar_lea.hbm %s2911_s16, 512  ;;  %s2278_s7 = scalar_lea.hbm %s3075_s28, 1024 }
 0xa9d   : > { %p2275_p10 = scmp.ne.s32.totalorder %s2911_s16, %s2274_s11  ;;  %p2279_p12 = scmp.lt.u32.totalorder %s2911_s16, %s3075_s28 }
 0xa9e   : > { %p2280_p0 = scmp.lt.u32.totalorder %s2278_s7, %s2274_s11  ;;  %p2282_p9 = scmp.lt.u32.totalorder %s2274_s11, %s2911_s16 }
 0xa9f   : > { %p2276_p3 = pnand %p2275_p10, %p3076_p13 }
 0xaa0   : > { %p2281_p7 = por %p2280_p0, %p2279_p12 }
 0xaa1   : > { %p2277_p8 = pneg %p2276_p3 }
 0xaa2   : > { %p2283_p11 = por %p2282_p9, %p2281_p7 }
 0xaa4   : > { %p2284_p1 = pnand %p2283_p11, %p2277_p8 }
 0xaa6   : > { %2287 = shalt.err (!%p2284_p1)
}
 0xaa7   : > { %s2387_s24 = smov 128   ;;  %s2388_s18 = smov 8  }
 0xaa8   : > { %1945 = dma.vmem_to_hbm [thread:$0]  (%p3076_p13), %s2913_s20, 512, %s2911_s16, %s1500_s17, %s2387_s24, %s2387_s24, %s2388_s18  }
 0xaa9   : > { %s3077_s12 = sld [smem:[#allocation33_spill]]  ;;  %s3078_s20 = sld [smem:[#allocation34_spill]] }
 0xaaa   : > { %s1766_s16 = sshll.u32 %s2476_s27, 7  ;;  %s561_s17 = scalar_lea.vmem [#allocation14], %s2741_s4 }
 0xaab   : > { %s1513_s25 = sshll.u32 %s561_s17, 4  ;;  %s3079_s11 = sld [smem:[#allocation35_spill]]  ;;  %s2952_s25 = int_to_ptr.vmem [resolvable:$true] %s1513_s25 }
 0xaac   : > { %s1495_s3 = scalar_lea.sflag [#allocation4], %s2738_s14  ;;  %s2288_s7 = scalar_lea.vmem %s2952_s25, 128 }
 0xaad   : > { %p2289_p6 = scmp.ne.s32.totalorder %s2952_s25, %s2288_s7  ;;  %s2389_s27 = smov [#allocation14]  }
 0xaae   : > { %s2292_s4 = sshll.u32 %s2389_s27, 4  ;;  %s2293_s4 = int_to_ptr.vmem [resolvable:$false] %s2292_s4 }
 0xaaf   : > { %v1762_v29 = vld [vmem:[%s3077_s12] ss:$0 sm:$0xff]  ;;  %p2290_p5 = pnand %p2289_p6, %p3076_p13  ;;  %s2294_s30 = scalar_lea.vmem %s2293_s4, 256 }
 0xab0   : > { %v1763_v30 = vld [vmem:[%s3078_s20] ss:$0 sm:$0xff]  ;;  %p2295_p4 = scmp.lt.s32.totalorder %s2952_s25, %s2293_s4  ;;  %p2296_p10 = scmp.lt.s32.totalorder %s2294_s30, %s2288_s7 }
 0xab1   : > { %s2950_s1 = scalar_lea.hbm %s3079_s11, %s1766_s16  ;;  %p2291_p2 = pneg %p2290_p5 }
 0xab2   : > { %p2297_p3 = por %p2296_p10, %p2295_p4 }
 0xab4   : > { %p2298_p8 = pnand %p2297_p3, %p2291_p2 }
 0xb25   : > { %v1464_v12 = vpop.xlane.xlu1 %1463 }
 0xb26   : > { %v1469_v21 = vmul.f32 0.03125, %v1464_v12 }
 0xb27   : > { %v1468_v22 = vpop.xlane.xlu0 %1467 }
 0xb28   : > { %v1471_v23 = vmul.f32 %v1469_v21, %v1469_v21  ;;  %v1470_v24 = vmul.f32 0.03125, %v1468_v22  ;;  %v1473_v27 = vsub.f32 %v1909_v14, %v1469_v21 }
 0xb2a   : > { %v1472_v25 = vsub.f32 %v1470_v24, %v1471_v23 }
 0xb2c   : > { %v1474_v26 = vadd.f32 1e-06, %v1472_v25 }
 0xb2e   : > { %2056 = vrsqrt.f32 %v1474_v26 }
 0xb38   : > { %v2057_v28 = vpop.eup %2056 }
 0xb39   : > { %v1476_v18 = vmul.f32 %v2057_v28, %v1473_v27 }
 0xb3b   : > { %v1484_v31 = vmul.f32 %v1762_v29, %v1476_v18 }
 0xb3d   : > { %v1492_v32 = vadd.f32 %v1763_v30, %v1484_v31 }
 0xb3f   : > { %1493 = vst.msk [vmem:[%s561_s17] sm:$0xff] %vm652_vm2, %v1492_v32 }
 0xb40   : > { %2301 = shalt.err (!%p2298_p8)
}
 0xb41   : > { %s2302_s14 = scalar_lea.hbm %s2950_s1, 128  ;;  %s2306_s18 = scalar_lea.hbm %s3079_s11, 256 }
 0xb42   : > { %p2303_p12 = scmp.ne.s32.totalorder %s2950_s1, %s2302_s14  ;;  %p2307_p9 = scmp.lt.u32.totalorder %s2950_s1, %s3079_s11 }
 0xb43   : > { %p2308_p11 = scmp.lt.u32.totalorder %s2306_s18, %s2302_s14  ;;  %p2310_p6 = scmp.lt.u32.totalorder %s2302_s14, %s2950_s1 }
 0xb44   : > { %p2304_p0 = pnand %p2303_p12, %p3076_p13 }
 0xb45   : > { %p2309_p1 = por %p2308_p11, %p2307_p9 }
 0xb46   : > { %p2305_p7 = pneg %p2304_p0 }
 0xb47   : > { %p2311_p5 = por %p2310_p6, %p2309_p1 }
 0xb49   : > { %p2312_p2 = pnand %p2311_p5, %p2305_p7 }
 0xb4b   : > { %2315 = shalt.err (!%p2312_p2)
}
 0xb4c   : > { %1944 = dma.vmem_to_hbm [thread:$0]  (%p3076_p13), %s2952_s25, 128, %s2950_s1, %s1495_s3  }
 0xb4d PF: > { %s3080_s12 = sld [smem:[#allocation23_spill]]  ;;  %s3081_s19 = sld [smem:[#allocation28_spill]] }
 0xb4e   : > { %s3082_s29 = sld [smem:[#allocation24_spill]] }
 0xb53   : > { %s1541_s20 = sand.u32 1, %s3080_s12   ;;  %p3083_p4 = scmp.ne.s32.totalorder %s3081_s19, 0 }
 0xb54   : > { %p3084_p10 = scmp.ge.s32.totalorder %s3082_s29, 2  ;;  %s1542_s16 = scalar_lea.sflag [#allocation4], %s1541_s20 }
 0xb56   : > { %p1972_p3 = pnand %p3084_p10, %p3083_p4 }
 0xb58   : > { %2349 = dma.done.wait (!%p1972_p3), %s1542_s16, 128  }
 0xb59   : > { %2351 = vsyncadd (!%p1972_p3), %s1542_s16, 4294967168  ;;  %s1551_s17 = scalar_lea.sflag [#allocation16], %s1541_s20 }
 0xb5a   : > { %2353 = dma.done.wait (!%p1972_p3), %s1551_s17, 512  }
 0xb5b   : > { %2355 = vsyncadd (!%p1972_p3), %s1551_s17, 4294966784  ;;  %s3085_s24 = sld [smem:[#allocation25_spill]]  ;;  %s3086_s10 = sld [smem:[#allocation26_spill]] }
 0xb5c   : > { %s3087_s21 = smov %s2362_s22  ;;  %s3088_s22 = smov %s2366_s23 }
 0xb61   : > { %p34_p13 = scmp.ge.s32.totalorder %s3085_s24, 4   ;;  %s3089_s23 = smov %s3086_s10 }
 0xb63   :  { %36 = sbr.rel (!%p34_p13) target bundleno = 20 (0x14), region = 172 }
 0xb6a   :  { %1556 = vsyncpa [#allocation3], 1 }
 0xb6b   :  { %1558 = vsyncpa [#allocation3 + $0x1], 1 }
 0xb6c   :  { %1559 = vsyncpa [#allocation6], 1 }
 0xb6d   :  { %1561 = vsyncpa [#allocation6 + $0x1], 1 }
 0xb6e   :  { %1562 = vsyncpa [#allocation9], 1 }
 0xb6f   :  { %1563 = vsyncpa [#allocation12], 1 }
 0xb70   :  { %1564 = vsyncpa [#allocation4], 1 }
 0xb71   :  { %1566 = vsyncpa [#allocation4 + $0x1], 1 }
 0xb72   :  { %1567 = vsyncpa [#allocation16], 1 }
 0xb73   :  { %1569 = vsyncpa [#allocation16 + $0x1], 1 }

</bundles_post_ra>
